<compile_context>
chip_gen: v6e
topology: v6e:2x2x1
jax: 0.10.0
libtpu: 0.0.40
codegen_flags: <defaults>
</compile_context>

<pallas_src>
import functools

import jax
import jax.numpy as jnp
import numpy as np
from jax.experimental import pallas as pl
from jax.experimental.pallas import tpu as pltpu

KH = 7
KW = 7
PAD = 3  # (kernel_size - 1) // 2

# Explicit scoped-VMEM budget: safe on v5e/v6e (128 MiB physical) and v7x (64 MiB physical).
_VMEM_LIMIT_BYTES = 32 * 1024 * 1024


# -----------------------------------------------------------------------------
# Pass 1: pooled 7x7 conv (banded MXU matmuls) -> folded BN -> sigmoid gate map
# -----------------------------------------------------------------------------
def _gate_map_kernel(bnb_ref, bands_ref, x_ref, gate_ref):
    # bnb_ref   : SMEM (1,)            folded BatchNorm bias
    # bands_ref : VMEM (2, KH, W, W)   banded horizontal-tap matrices (BN scale folded in)
    # x_ref     : VMEM (1, C, H, W)
    # gate_ref  : VMEM (1, H, W) f32
    x = x_ref[0].astype(jnp.float32)            # (C, H, W)
    _, H, W = x.shape

    # ChannelPool: channel 0 = max over C, channel 1 = mean over C.
    pmax = jnp.max(x, axis=0)                   # (H, W)
    pmean = jnp.mean(x, axis=0)                 # (H, W)

    # Hoisted row-validity masks: one per vertical tap (6 non-trivial), shared by both
    # pooled channels.  Horizontal padding is encoded as zeros inside the band matrices,
    # so there are no per-tap masks at all.
    row = jax.lax.broadcasted_iota(jnp.int32, (H, W), 0)

    # Two independent partial accumulators (one per pooled channel) instead of one long
    # serial accumulator chain.
    acc_max = jnp.zeros((H, W), jnp.float32)
    acc_mean = jnp.zeros((H, W), jnp.float32)
    for ky in range(KH):
        dy = ky - PAD
        if dy == 0:
            r_max, r_mean = pmax, pmean
        else:
            rmask = (row + dy >= 0) & (row + dy < H)
            r_max = jnp.where(rmask, pltpu.roll(pmax, (-dy) % H, axis=0), 0.0)
            r_mean = jnp.where(rmask, pltpu.roll(pmean, (-dy) % H, axis=0), 0.0)
        # All 7 horizontal taps of this (channel, ky) in a single MXU matmul.
        acc_max = acc_max + jnp.dot(
            r_max, bands_ref[0, ky],
            preferred_element_type=jnp.float32,
            precision=jax.lax.Precision.HIGHEST)
        acc_mean = acc_mean + jnp.dot(
            r_mean, bands_ref[1, ky],
            preferred_element_type=jnp.float32,
            precision=jax.lax.Precision.HIGHEST)

    conv = acc_max + acc_mean + bnb_ref[0]      # folded eval-mode BatchNorm, relu=False
    gate_ref[0] = jax.nn.sigmoid(conv).astype(gate_ref.dtype)


# -----------------------------------------------------------------------------
# Pass 2: lane-dense elementwise gating  out = x * gate
# -----------------------------------------------------------------------------
def _gating_kernel(x_ref, gate_ref, o_ref):
    # x_ref    : VMEM (1, Ct, H*W)
    # gate_ref : VMEM (1, 1, H*W) f32
    # o_ref    : VMEM (1, Ct, H*W)
    gate = gate_ref[0]                                          # (1, H*W), broadcasts over C
    o_ref[0] = (x_ref[0].astype(jnp.float32) * gate).astype(o_ref.dtype)


# -----------------------------------------------------------------------------
# Host-side helpers
# -----------------------------------------------------------------------------
def _build_bands(w_folded, width):
    """(2, KH, KW) folded conv weights -> (2, KH, W, W) banded horizontal-tap matrices.

    bands[c, ky, j, i] = w_folded[c, ky, j - i + PAD] (zero outside the band), so that
    (row_vec @ bands[c, ky])[i] = sum_kx w[c, ky, kx] * row_vec[i + kx - PAD] with zero padding.
    """
    j = np.arange(width)[:, None]     # input column
    i = np.arange(width)[None, :]     # output column
    kx = j - i + PAD
    valid = (kx >= 0) & (kx < KW)
    kx_clipped = np.clip(kx, 0, KW - 1)
    bands = np.zeros((2, KH, width, width), np.float32)
    for c in range(2):
        for ky in range(KH):
            bands[c, ky] = np.where(valid, w_folded[c, ky][kx_clipped], 0.0)
    return bands


def _pick_channel_tile(C, HW, itemsize, budget_bytes=1 << 20):
    """Largest legal channel tile (== C, or a multiple of 8 dividing C) within ~budget."""
    if C * HW * itemsize <= budget_bytes or C % 8 != 0:
        return C
    fitting = [d for d in range(8, C, 8) if C % d == 0 and d * HW * itemsize <= budget_bytes]
    return max(fitting) if fitting else 8


@functools.partial(jax.jit, donate_argnums=(0,))
def _spatial_gate_impl(x, bands, bn_bias):
    B, C, H, W = x.shape
    HW = H * W

    # ---- Pass 1: per-batch sigmoid gate map (only 2*H*W of conv work per step) ----
    gate = pl.pallas_call(
        _gate_map_kernel,
        out_shape=jax.ShapeDtypeStruct((B, H, W), jnp.float32),
        grid_spec=pltpu.PrefetchScalarGridSpec(
            num_scalar_prefetch=1,                                       # folded BN bias -> SMEM
            grid=(B,),
            in_specs=[
                pl.BlockSpec((2, KH, W, W), lambda b, bnb: (0, 0, 0, 0)),  # bands (VMEM, resident)
                pl.BlockSpec((1, C, H, W), lambda b, bnb: (b, 0, 0, 0)),   # x
            ],
            out_specs=pl.BlockSpec((1, H, W), lambda b, bnb: (b, 0, 0)),
        ),
        compiler_params=pltpu.CompilerParams(
            dimension_semantics=("parallel",),
            vmem_limit_bytes=_VMEM_LIMIT_BYTES),
    )(bn_bias, bands, x)
    # TODO(synk): for very large C*H*W, pass 1 should additionally tile C with a pooled-stats
    #             accumulator (and tile H*W in pass 2) to stay inside VMEM.

    # ---- Pass 2: lane-dense elementwise gating, tiled over (batch, channel) ----
    x_flat = x.reshape(B, C, HW)          # minor dim = H*W lanes (256 here -> unmasked stores)
    gate_flat = gate.reshape(B, 1, HW)
    ct = _pick_channel_tile(C, HW, x.dtype.itemsize)

    out_flat = pl.pallas_call(
        _gating_kernel,
        out_shape=jax.ShapeDtypeStruct((B, C, HW), x.dtype),
        grid_spec=pltpu.PrefetchScalarGridSpec(
            num_scalar_prefetch=0,
            grid=(B, C // ct),
            in_specs=[
                pl.BlockSpec((1, ct, HW), lambda b, c: (b, c, 0)),
                pl.BlockSpec((1, 1, HW), lambda b, c: (b, 0, 0)),
            ],
            out_specs=pl.BlockSpec((1, ct, HW), lambda b, c: (b, c, 0)),
        ),
        compiler_params=pltpu.CompilerParams(
            dimension_semantics=("parallel", "parallel"),
            vmem_limit_bytes=_VMEM_LIMIT_BYTES),
        input_output_aliases={0: 0},      # reuse the (donated) x buffer for the output
    )(x_flat, gate_flat)

    return out_flat.reshape(B, C, H, W)


def spatial_gate(x, conv_w, bn_scale, bn_bias):
    """SpatialGate forward. conv_w: (1, 2, 7, 7); bn_scale/bn_bias: eval-mode folded BN.

    NOTE: `x` is donated (its buffer is reused for the output); do not use it afterwards.
    """
    w_folded = np.asarray(conv_w, np.float32)[0] * float(bn_scale)       # (2, KH, KW)
    bands = jnp.asarray(_build_bands(w_folded, x.shape[-1]))             # (2, KH, W, W)
    bnb = jnp.full((1,), float(bn_bias), jnp.float32)
    return _spatial_gate_impl(x, bands, bnb)


def spatial_gate_reference(x, conv_w, bn_scale, bn_bias):
    """Pure-JAX reference mirroring the PyTorch forward (eval-mode BN)."""
    xmax = jnp.max(x, axis=1, keepdims=True)
    xmean = jnp.mean(x, axis=1, keepdims=True)
    pooled = jnp.concatenate([xmax, xmean], axis=1)                      # (B, 2, H, W)
    conv = jax.lax.conv_general_dilated(
        pooled, conv_w, window_strides=(1, 1),
        padding=((PAD, PAD), (PAD, PAD)),
        dimension_numbers=("NCHW", "OIHW", "NCHW"),
        precision=jax.lax.Precision.HIGHEST)                             # (B, 1, H, W)
    y = conv * bn_scale + bn_bias
    return x * jax.nn.sigmoid(y)


if __name__ == "__main__":
    B, C, H, W = 2, 4, 16, 16

    key = jax.random.PRNGKey(0)
    k_x, k_w = jax.random.split(key)
    x = jax.random.normal(k_x, (B, C, H, W), dtype=jnp.float32)

    # Conv2d(2, 1, 7, bias=False) weights, deterministic init.
    conv_w = jax.random.normal(k_w, (1, 2, KH, KW), dtype=jnp.float32) * 0.1

    # BatchNorm2d(1) parameters at PyTorch defaults (eval semantics).
    eps = 1e-5
    gamma = jnp.ones((1,), jnp.float32)
    beta = jnp.zeros((1,), jnp.float32)
    running_mean = jnp.zeros((1,), jnp.float32)
    running_var = jnp.ones((1,), jnp.float32)
    bn_scale = gamma / jnp.sqrt(running_var + eps)        # scalar (out_channels = 1)
    bn_bias = beta - running_mean * bn_scale              # scalar

    # Reference first (x is donated to the Pallas path below).
    ref = spatial_gate_reference(x, conv_w, bn_scale[0], bn_bias[0])
    ref = jax.block_until_ready(ref)

    out = spatial_gate(x, conv_w, float(bn_scale[0]), float(bn_bias[0]))
    out = jax.block_until_ready(out)

    np.testing.assert_allclose(np.asarray(out), np.asarray(ref), rtol=1e-4, atol=1e-4)
    print("KERNEL_OK")
</pallas_src>

<mosaic_0001>
module attributes {stable_mosaic.version = 11 : i64} {
  func.func @_gating_kernel(%arg0: i32, %arg1: i32, %arg2: memref<1x4x256xf32, #tpu.memory_space<vmem>>, %arg3: memref<1x1x256xf32, #tpu.memory_space<vmem>>, %arg4: memref<1x4x256xf32, #tpu.memory_space<vmem>>) attributes {dimension_semantics = [#tpu.dimension_semantics<parallel>, #tpu.dimension_semantics<parallel>], iteration_bounds = array<i64: 2, 1>, scalar_prefetch = 0 : i64, scratch_operands = 0 : i64, tpu.core_type = #tpu.core_type<tc>, window_params = [{transform_indices = @transform_0, window_bounds = array<i64: 1, 4, 256>}, {transform_indices = @transform_1, window_bounds = array<i64: 1, 1, 256>}, {transform_indices = @transform_2, window_bounds = array<i64: 1, 4, 256>}]} {
    %c0 = arith.constant 0 : index
    %c0_0 = arith.constant 0 : index
    %c0_1 = arith.constant 0 : index
    %0 = vector.load %arg3[%c0, %c0_0, %c0_1] : memref<1x1x256xf32, #tpu.memory_space<vmem>>, vector<1x1x256xf32>
    %1 = vector.shape_cast %0 : vector<1x1x256xf32> to vector<1x256xf32>
    %c0_2 = arith.constant 0 : index
    %c0_3 = arith.constant 0 : index
    %c0_4 = arith.constant 0 : index
    %2 = vector.load %arg2[%c0_2, %c0_3, %c0_4] : memref<1x4x256xf32, #tpu.memory_space<vmem>>, vector<1x4x256xf32>
    %3 = vector.shape_cast %2 : vector<1x4x256xf32> to vector<4x256xf32>
    %4 = vector.broadcast %1 : vector<1x256xf32> to vector<4x256xf32>
    %5 = arith.mulf %3, %4 : vector<4x256xf32>
    %c0_5 = arith.constant 0 : index
    %c0_6 = arith.constant 0 : index
    %c0_7 = arith.constant 0 : index
    %6 = vector.load %arg4[%c0_5, %c0_6, %c0_7] : memref<1x4x256xf32, #tpu.memory_space<vmem>>, vector<1x4x256xf32>
    %7 = vector.shape_cast %6 : vector<1x4x256xf32> to vector<4x256xf32>
    %8 = vector.shape_cast %5 : vector<4x256xf32> to vector<1x4x256xf32>
    tpu.vector_store %arg4[%c0_5, %c0_6, %c0_7], %8 {strides = array<i32>} : memref<1x4x256xf32, #tpu.memory_space<vmem>>, vector<1x4x256xf32>,
    return
  }
  func.func @transform_0(%arg0: i32, %arg1: i32) -> (i32, i32, i32) {
    %c0_i32 = arith.constant 0 : i32
    %c0_i32_0 = arith.constant 0 : i32
    return %arg0, %arg1, %c0_i32 : i32, i32, i32
  }
  func.func @transform_1(%arg0: i32, %arg1: i32) -> (i32, i32, i32) {
    %c0_i32 = arith.constant 0 : i32
    %c0_i32_0 = arith.constant 0 : i32
    %c0_i32_1 = arith.constant 0 : i32
    return %arg0, %c0_i32, %c0_i32_0 : i32, i32, i32
  }
  func.func @transform_2(%arg0: i32, %arg1: i32) -> (i32, i32, i32) {
    %c0_i32 = arith.constant 0 : i32
    %c0_i32_0 = arith.constant 0 : i32
    return %arg0, %arg1, %c0_i32 : i32, i32, i32
  }
}

module attributes {stable_mosaic.version = 11 : i64} {
  func.func @_gate_map_kernel(%arg0: i32, %arg1: memref<1xf32, #tpu.memory_space<smem>>, %arg2: memref<2x7x16x16xf32, #tpu.memory_space<vmem>>, %arg3: memref<1x4x16x16xf32, #tpu.memory_space<vmem>>, %arg4: memref<1x16x16xf32, #tpu.memory_space<vmem>>) attributes {dimension_semantics = [#tpu.dimension_semantics<parallel>], iteration_bounds = array<i64: 2>, scalar_prefetch = 1 : i64, scratch_operands = 0 : i64, tpu.core_type = #tpu.core_type<tc>, window_params = [{pipeline_mode = #tpu.pipeline_mode<synchronous>, transform_indices = @transform_0, window_bounds = array<i64: 2, 7, 16, 16>}, {transform_indices = @transform_1, window_bounds = array<i64: 1, 4, 16, 16>}, {transform_indices = @transform_2, window_bounds = array<i64: 1, 16, 16>}]} {
    %c0 = arith.constant 0 : index
    %c0_0 = arith.constant 0 : index
    %c0_1 = arith.constant 0 : index
    %c0_2 = arith.constant 0 : index
    %0 = vector.load %arg3[%c0, %c0_0, %c0_1, %c0_2] : memref<1x4x16x16xf32, #tpu.memory_space<vmem>>, vector<1x4x16x16xf32>
    %1 = vector.shape_cast %0 : vector<1x4x16x16xf32> to vector<4x16x16xf32>
    %cst = arith.constant dense<0xFF800000> : vector<16x16xf32>
    %2 = vector.multi_reduction <maximumf>, %1, %cst [0] : vector<4x16x16xf32> to vector<16x16xf32>
    %cst_3 = arith.constant dense<0.000000e+00> : vector<16x16xf32>
    %3 = vector.multi_reduction <add>, %1, %cst_3 [0] : vector<4x16x16xf32> to vector<16x16xf32>
    %cst_4 = arith.constant 4.000000e+00 : f32
    %4 = vector.broadcast %cst_4 : f32 to vector<16x16xf32>
    %5 = arith.divf %3, %4 : vector<16x16xf32>
    %6 = tpu.iota {dimensions = array<i32: 0>} : vector<16x16xi32>
    %cst_5 = arith.constant 0.000000e+00 : f32
    %7 = vector.broadcast %cst_5 : f32 to vector<16x16xf32>
    %cst_6 = arith.constant 0.000000e+00 : f32
    %8 = vector.broadcast %cst_6 : f32 to vector<16x16xf32>
    %c-3_i32 = arith.constant -3 : i32
    %9 = vector.broadcast %c-3_i32 : i32 to vector<16x16xi32>
    %10 = arith.addi %6, %9 : vector<16x16xi32>
    %c0_i32 = arith.constant 0 : i32
    %11 = vector.broadcast %c0_i32 : i32 to vector<16x16xi32>
    %12 = arith.cmpi sge, %10, %11 : vector<16x16xi32>
    %c-3_i32_7 = arith.constant -3 : i32
    %13 = vector.broadcast %c-3_i32_7 : i32 to vector<16x16xi32>
    %14 = arith.addi %6, %13 : vector<16x16xi32>
    %c16_i32 = arith.constant 16 : i32
    %15 = vector.broadcast %c16_i32 : i32 to vector<16x16xi32>
    %16 = arith.cmpi slt, %14, %15 : vector<16x16xi32>
    %17 = arith.andi %12, %16 : vector<16x16xi1>
    %c3_i32 = arith.constant 3 : i32
    %18 = tpu.dynamic_rotate %2 by %c3_i32 dim 0 : vector<16x16xf32>, i32 -> vector<16x16xf32>
    %cst_8 = arith.constant 0.000000e+00 : f32
    %19 = vector.broadcast %cst_8 : f32 to vector<16x16xf32>
    %20 = arith.select %17, %18, %19 : vector<16x16xi1>, vector<16x16xf32>
    %c3_i32_9 = arith.constant 3 : i32
    %21 = tpu.dynamic_rotate %5 by %c3_i32_9 dim 0 : vector<16x16xf32>, i32 -> vector<16x16xf32>
    %cst_10 = arith.constant 0.000000e+00 : f32
    %22 = vector.broadcast %cst_10 : f32 to vector<16x16xf32>
    %23 = arith.select %17, %21, %22 : vector<16x16xi1>, vector<16x16xf32>
    %c0_11 = arith.constant 0 : index
    %c0_12 = arith.constant 0 : index
    %c0_13 = arith.constant 0 : index
    %c0_14 = arith.constant 0 : index
    %24 = vector.load %arg2[%c0_11, %c0_12, %c0_13, %c0_14] : memref<2x7x16x16xf32, #tpu.memory_space<vmem>>, vector<1x1x16x16xf32>
    %25 = vector.shape_cast %24 : vector<1x1x16x16xf32> to vector<16x16xf32>
    %cst_15 = arith.constant dense<0.000000e+00> : vector<16x16xf32>
    %26 = tpu.matmul %20, %25, %cst_15 {dimension_numbers = #tpu.dot_dimension_numbers<[1], [0], [0], [1], [0, 0, 1, 1], [], []>, precision = #tpu.contract_precision<fp32>} : vector<16x16xf32>, vector<16x16xf32>, vector<16x16xf32> -> vector<16x16xf32>
    %27 = arith.addf %7, %26 : vector<16x16xf32>
    %c1 = arith.constant 1 : index
    %c0_16 = arith.constant 0 : index
    %c0_17 = arith.constant 0 : index
    %c0_18 = arith.constant 0 : index
    %28 = vector.load %arg2[%c1, %c0_16, %c0_17, %c0_18] : memref<2x7x16x16xf32, #tpu.memory_space<vmem>>, vector<1x1x16x16xf32>
    %29 = vector.shape_cast %28 : vector<1x1x16x16xf32> to vector<16x16xf32>
    %cst_19 = arith.constant dense<0.000000e+00> : vector<16x16xf32>
    %30 = tpu.matmul %23, %29, %cst_19 {dimension_numbers = #tpu.dot_dimension_numbers<[1], [0], [0], [1], [0, 0, 1, 1], [], []>, precision = #tpu.contract_precision<fp32>} : vector<16x16xf32>, vector<16x16xf32>, vector<16x16xf32> -> vector<16x16xf32>
    %31 = arith.addf %8, %30 : vector<16x16xf32>
    %c-2_i32 = arith.constant -2 : i32
    %32 = vector.broadcast %c-2_i32 : i32 to vector<16x16xi32>
    %33 = arith.addi %6, %32 : vector<16x16xi32>
    %c0_i32_20 = arith.constant 0 : i32
    %34 = vector.broadcast %c0_i32_20 : i32 to vector<16x16xi32>
    %35 = arith.cmpi sge, %33, %34 : vector<16x16xi32>
    %c-2_i32_21 = arith.constant -2 : i32
    %36 = vector.broadcast %c-2_i32_21 : i32 to vector<16x16xi32>
    %37 = arith.addi %6, %36 : vector<16x16xi32>
    %c16_i32_22 = arith.constant 16 : i32
    %38 = vector.broadcast %c16_i32_22 : i32 to vector<16x16xi32>
    %39 = arith.cmpi slt, %37, %38 : vector<16x16xi32>
    %40 = arith.andi %35, %39 : vector<16x16xi1>
    %c2_i32 = arith.constant 2 : i32
    %41 = tpu.dynamic_rotate %2 by %c2_i32 dim 0 : vector<16x16xf32>, i32 -> vector<16x16xf32>
    %cst_23 = arith.constant 0.000000e+00 : f32
    %42 = vector.broadcast %cst_23 : f32 to vector<16x16xf32>
    %43 = arith.select %40, %41, %42 : vector<16x16xi1>, vector<16x16xf32>
    %c2_i32_24 = arith.constant 2 : i32
    %44 = tpu.dynamic_rotate %5 by %c2_i32_24 dim 0 : vector<16x16xf32>, i32 -> vector<16x16xf32>
    %cst_25 = arith.constant 0.000000e+00 : f32
    %45 = vector.broadcast %cst_25 : f32 to vector<16x16xf32>
    %46 = arith.select %40, %44, %45 : vector<16x16xi1>, vector<16x16xf32>
    %c0_26 = arith.constant 0 : index
    %c1_27 = arith.constant 1 : index
    %c0_28 = arith.constant 0 : index
    %c0_29 = arith.constant 0 : index
    %47 = vector.load %arg2[%c0_26, %c1_27, %c0_28, %c0_29] : memref<2x7x16x16xf32, #tpu.memory_space<vmem>>, vector<1x1x16x16xf32>
    %48 = vector.shape_cast %47 : vector<1x1x16x16xf32> to vector<16x16xf32>
    %cst_30 = arith.constant dense<0.000000e+00> : vector<16x16xf32>
    %49 = tpu.matmul %43, %48, %cst_30 {dimension_numbers = #tpu.dot_dimension_numbers<[1], [0], [0], [1], [0, 0, 1, 1], [], []>, precision = #tpu.contract_precision<fp32>} : vector<16x16xf32>, vector<16x16xf32>, vector<16x16xf32> -> vector<16x16xf32>
    %50 = arith.addf %27, %49 : vector<16x16xf32>
    %c1_31 = arith.constant 1 : index
    %c1_32 = arith.constant 1 : index
    %c0_33 = arith.constant 0 : index
    %c0_34 = arith.constant 0 : index
    %51 = vector.load %arg2[%c1_31, %c1_32, %c0_33, %c0_34] : memref<2x7x16x16xf32, #tpu.memory_space<vmem>>, vector<1x1x16x16xf32>
    %52 = vector.shape_cast %51 : vector<1x1x16x16xf32> to vector<16x16xf32>
    %cst_35 = arith.constant dense<0.000000e+00> : vector<16x16xf32>
    %53 = tpu.matmul %46, %52, %cst_35 {dimension_numbers = #tpu.dot_dimension_numbers<[1], [0], [0], [1], [0, 0, 1, 1], [], []>, precision = #tpu.contract_precision<fp32>} : vector<16x16xf32>, vector<16x16xf32>, vector<16x16xf32> -> vector<16x16xf32>
    %54 = arith.addf %31, %53 : vector<16x16xf32>
    %c-1_i32 = arith.constant -1 : i32
    %55 = vector.broadcast %c-1_i32 : i32 to vector<16x16xi32>
    %56 = arith.addi %6, %55 : vector<16x16xi32>
    %c0_i32_36 = arith.constant 0 : i32
    %57 = vector.broadcast %c0_i32_36 : i32 to vector<16x16xi32>
    %58 = arith.cmpi sge, %56, %57 : vector<16x16xi32>
    %c-1_i32_37 = arith.constant -1 : i32
    %59 = vector.broadcast %c-1_i32_37 : i32 to vector<16x16xi32>
    %60 = arith.addi %6, %59 : vector<16x16xi32>
    %c16_i32_38 = arith.constant 16 : i32
    %61 = vector.broadcast %c16_i32_38 : i32 to vector<16x16xi32>
    %62 = arith.cmpi slt, %60, %61 : vector<16x16xi32>
    %63 = arith.andi %58, %62 : vector<16x16xi1>
    %c1_i32 = arith.constant 1 : i32
    %64 = tpu.dynamic_rotate %2 by %c1_i32 dim 0 : vector<16x16xf32>, i32 -> vector<16x16xf32>
    %cst_39 = arith.constant 0.000000e+00 : f32
    %65 = vector.broadcast %cst_39 : f32 to vector<16x16xf32>
    %66 = arith.select %63, %64, %65 : vector<16x16xi1>, vector<16x16xf32>
    %c1_i32_40 = arith.constant 1 : i32
    %67 = tpu.dynamic_rotate %5 by %c1_i32_40 dim 0 : vector<16x16xf32>, i32 -> vector<16x16xf32>
    %cst_41 = arith.constant 0.000000e+00 : f32
    %68 = vector.broadcast %cst_41 : f32 to vector<16x16xf32>
    %69 = arith.select %63, %67, %68 : vector<16x16xi1>, vector<16x16xf32>
    %c0_42 = arith.constant 0 : index
    %c2 = arith.constant 2 : index
    %c0_43 = arith.constant 0 : index
    %c0_44 = arith.constant 0 : index
    %70 = vector.load %arg2[%c0_42, %c2, %c0_43, %c0_44] : memref<2x7x16x16xf32, #tpu.memory_space<vmem>>, vector<1x1x16x16xf32>
    %71 = vector.shape_cast %70 : vector<1x1x16x16xf32> to vector<16x16xf32>
    %cst_45 = arith.constant dense<0.000000e+00> : vector<16x16xf32>
    %72 = tpu.matmul %66, %71, %cst_45 {dimension_numbers = #tpu.dot_dimension_numbers<[1], [0], [0], [1], [0, 0, 1, 1], [], []>, precision = #tpu.contract_precision<fp32>} : vector<16x16xf32>, vector<16x16xf32>, vector<16x16xf32> -> vector<16x16xf32>
    %73 = arith.addf %50, %72 : vector<16x16xf32>
    %c1_46 = arith.constant 1 : index
    %c2_47 = arith.constant 2 : index
    %c0_48 = arith.constant 0 : index
    %c0_49 = arith.constant 0 : index
    %74 = vector.load %arg2[%c1_46, %c2_47, %c0_48, %c0_49] : memref<2x7x16x16xf32, #tpu.memory_space<vmem>>, vector<1x1x16x16xf32>
    %75 = vector.shape_cast %74 : vector<1x1x16x16xf32> to vector<16x16xf32>
    %cst_50 = arith.constant dense<0.000000e+00> : vector<16x16xf32>
    %76 = tpu.matmul %69, %75, %cst_50 {dimension_numbers = #tpu.dot_dimension_numbers<[1], [0], [0], [1], [0, 0, 1, 1], [], []>, precision = #tpu.contract_precision<fp32>} : vector<16x16xf32>, vector<16x16xf32>, vector<16x16xf32> -> vector<16x16xf32>
    %77 = arith.addf %54, %76 : vector<16x16xf32>
    %c0_51 = arith.constant 0 : index
    %c3 = arith.constant 3 : index
    %c0_52 = arith.constant 0 : index
    %c0_53 = arith.constant 0 : index
    %78 = vector.load %arg2[%c0_51, %c3, %c0_52, %c0_53] : memref<2x7x16x16xf32, #tpu.memory_space<vmem>>, vector<1x1x16x16xf32>
    %79 = vector.shape_cast %78 : vector<1x1x16x16xf32> to vector<16x16xf32>
    %cst_54 = arith.constant dense<0.000000e+00> : vector<16x16xf32>
    %80 = tpu.matmul %2, %79, %cst_54 {dimension_numbers = #tpu.dot_dimension_numbers<[1], [0], [0], [1], [0, 0, 1, 1], [], []>, precision = #tpu.contract_precision<fp32>} : vector<16x16xf32>, vector<16x16xf32>, vector<16x16xf32> -> vector<16x16xf32>
    %81 = arith.addf %73, %80 : vector<16x16xf32>
    %c1_55 = arith.constant 1 : index
    %c3_56 = arith.constant 3 : index
    %c0_57 = arith.constant 0 : index
    %c0_58 = arith.constant 0 : index
    %82 = vector.load %arg2[%c1_55, %c3_56, %c0_57, %c0_58] : memref<2x7x16x16xf32, #tpu.memory_space<vmem>>, vector<1x1x16x16xf32>
    %83 = vector.shape_cast %82 : vector<1x1x16x16xf32> to vector<16x16xf32>
    %cst_59 = arith.constant dense<0.000000e+00> : vector<16x16xf32>
    %84 = tpu.matmul %5, %83, %cst_59 {dimension_numbers = #tpu.dot_dimension_numbers<[1], [0], [0], [1], [0, 0, 1, 1], [], []>, precision = #tpu.contract_precision<fp32>} : vector<16x16xf32>, vector<16x16xf32>, vector<16x16xf32> -> vector<16x16xf32>
    %85 = arith.addf %77, %84 : vector<16x16xf32>
    %c1_i32_60 = arith.constant 1 : i32
    %86 = vector.broadcast %c1_i32_60 : i32 to vector<16x16xi32>
    %87 = arith.addi %6, %86 : vector<16x16xi32>
    %c0_i32_61 = arith.constant 0 : i32
    %88 = vector.broadcast %c0_i32_61 : i32 to vector<16x16xi32>
    %89 = arith.cmpi sge, %87, %88 : vector<16x16xi32>
    %c1_i32_62 = arith.constant 1 : i32
    %90 = vector.broadcast %c1_i32_62 : i32 to vector<16x16xi32>
    %91 = arith.addi %6, %90 : vector<16x16xi32>
    %c16_i32_63 = arith.constant 16 : i32
    %92 = vector.broadcast %c16_i32_63 : i32 to vector<16x16xi32>
    %93 = arith.cmpi slt, %91, %92 : vector<16x16xi32>
    %94 = arith.andi %89, %93 : vector<16x16xi1>
    %c15_i32 = arith.constant 15 : i32
    %95 = tpu.dynamic_rotate %2 by %c15_i32 dim 0 : vector<16x16xf32>, i32 -> vector<16x16xf32>
    %cst_64 = arith.constant 0.000000e+00 : f32
    %96 = vector.broadcast %cst_64 : f32 to vector<16x16xf32>
    %97 = arith.select %94, %95, %96 : vector<16x16xi1>, vector<16x16xf32>
    %c15_i32_65 = arith.constant 15 : i32
    %98 = tpu.dynamic_rotate %5 by %c15_i32_65 dim 0 : vector<16x16xf32>, i32 -> vector<16x16xf32>
    %cst_66 = arith.constant 0.000000e+00 : f32
    %99 = vector.broadcast %cst_66 : f32 to vector<16x16xf32>
    %100 = arith.select %94, %98, %99 : vector<16x16xi1>, vector<16x16xf32>
    %c0_67 = arith.constant 0 : index
    %c4 = arith.constant 4 : index
    %c0_68 = arith.constant 0 : index
    %c0_69 = arith.constant 0 : index
    %101 = vector.load %arg2[%c0_67, %c4, %c0_68, %c0_69] : memref<2x7x16x16xf32, #tpu.memory_space<vmem>>, vector<1x1x16x16xf32>
    %102 = vector.shape_cast %101 : vector<1x1x16x16xf32> to vector<16x16xf32>
    %cst_70 = arith.constant dense<0.000000e+00> : vector<16x16xf32>
    %103 = tpu.matmul %97, %102, %cst_70 {dimension_numbers = #tpu.dot_dimension_numbers<[1], [0], [0], [1], [0, 0, 1, 1], [], []>, precision = #tpu.contract_precision<fp32>} : vector<16x16xf32>, vector<16x16xf32>, vector<16x16xf32> -> vector<16x16xf32>
    %104 = arith.addf %81, %103 : vector<16x16xf32>
    %c1_71 = arith.constant 1 : index
    %c4_72 = arith.constant 4 : index
    %c0_73 = arith.constant 0 : index
    %c0_74 = arith.constant 0 : index
    %105 = vector.load %arg2[%c1_71, %c4_72, %c0_73, %c0_74] : memref<2x7x16x16xf32, #tpu.memory_space<vmem>>, vector<1x1x16x16xf32>
    %106 = vector.shape_cast %105 : vector<1x1x16x16xf32> to vector<16x16xf32>
    %cst_75 = arith.constant dense<0.000000e+00> : vector<16x16xf32>
    %107 = tpu.matmul %100, %106, %cst_75 {dimension_numbers = #tpu.dot_dimension_numbers<[1], [0], [0], [1], [0, 0, 1, 1], [], []>, precision = #tpu.contract_precision<fp32>} : vector<16x16xf32>, vector<16x16xf32>, vector<16x16xf32> -> vector<16x16xf32>
    %108 = arith.addf %85, %107 : vector<16x16xf32>
    %c2_i32_76 = arith.constant 2 : i32
    %109 = vector.broadcast %c2_i32_76 : i32 to vector<16x16xi32>
    %110 = arith.addi %6, %109 : vector<16x16xi32>
    %c0_i32_77 = arith.constant 0 : i32
    %111 = vector.broadcast %c0_i32_77 : i32 to vector<16x16xi32>
    %112 = arith.cmpi sge, %110, %111 : vector<16x16xi32>
    %c2_i32_78 = arith.constant 2 : i32
    %113 = vector.broadcast %c2_i32_78 : i32 to vector<16x16xi32>
    %114 = arith.addi %6, %113 : vector<16x16xi32>
    %c16_i32_79 = arith.constant 16 : i32
    %115 = vector.broadcast %c16_i32_79 : i32 to vector<16x16xi32>
    %116 = arith.cmpi slt, %114, %115 : vector<16x16xi32>
    %117 = arith.andi %112, %116 : vector<16x16xi1>
    %c14_i32 = arith.constant 14 : i32
    %118 = tpu.dynamic_rotate %2 by %c14_i32 dim 0 : vector<16x16xf32>, i32 -> vector<16x16xf32>
    %cst_80 = arith.constant 0.000000e+00 : f32
    %119 = vector.broadcast %cst_80 : f32 to vector<16x16xf32>
    %120 = arith.select %117, %118, %119 : vector<16x16xi1>, vector<16x16xf32>
    %c14_i32_81 = arith.constant 14 : i32
    %121 = tpu.dynamic_rotate %5 by %c14_i32_81 dim 0 : vector<16x16xf32>, i32 -> vector<16x16xf32>
    %cst_82 = arith.constant 0.000000e+00 : f32
    %122 = vector.broadcast %cst_82 : f32 to vector<16x16xf32>
    %123 = arith.select %117, %121, %122 : vector<16x16xi1>, vector<16x16xf32>
    %c0_83 = arith.constant 0 : index
    %c5 = arith.constant 5 : index
    %c0_84 = arith.constant 0 : index
    %c0_85 = arith.constant 0 : index
    %124 = vector.load %arg2[%c0_83, %c5, %c0_84, %c0_85] : memref<2x7x16x16xf32, #tpu.memory_space<vmem>>, vector<1x1x16x16xf32>
    %125 = vector.shape_cast %124 : vector<1x1x16x16xf32> to vector<16x16xf32>
    %cst_86 = arith.constant dense<0.000000e+00> : vector<16x16xf32>
    %126 = tpu.matmul %120, %125, %cst_86 {dimension_numbers = #tpu.dot_dimension_numbers<[1], [0], [0], [1], [0, 0, 1, 1], [], []>, precision = #tpu.contract_precision<fp32>} : vector<16x16xf32>, vector<16x16xf32>, vector<16x16xf32> -> vector<16x16xf32>
    %127 = arith.addf %104, %126 : vector<16x16xf32>
    %c1_87 = arith.constant 1 : index
    %c5_88 = arith.constant 5 : index
    %c0_89 = arith.constant 0 : index
    %c0_90 = arith.constant 0 : index
    %128 = vector.load %arg2[%c1_87, %c5_88, %c0_89, %c0_90] : memref<2x7x16x16xf32, #tpu.memory_space<vmem>>, vector<1x1x16x16xf32>
    %129 = vector.shape_cast %128 : vector<1x1x16x16xf32> to vector<16x16xf32>
    %cst_91 = arith.constant dense<0.000000e+00> : vector<16x16xf32>
    %130 = tpu.matmul %123, %129, %cst_91 {dimension_numbers = #tpu.dot_dimension_numbers<[1], [0], [0], [1], [0, 0, 1, 1], [], []>, precision = #tpu.contract_precision<fp32>} : vector<16x16xf32>, vector<16x16xf32>, vector<16x16xf32> -> vector<16x16xf32>
    %131 = arith.addf %108, %130 : vector<16x16xf32>
    %c3_i32_92 = arith.constant 3 : i32
    %132 = vector.broadcast %c3_i32_92 : i32 to vector<16x16xi32>
    %133 = arith.addi %6, %132 : vector<16x16xi32>
    %c0_i32_93 = arith.constant 0 : i32
    %134 = vector.broadcast %c0_i32_93 : i32 to vector<16x16xi32>
    %135 = arith.cmpi sge, %133, %134 : vector<16x16xi32>
    %c3_i32_94 = arith.constant 3 : i32
    %136 = vector.broadcast %c3_i32_94 : i32 to vector<16x16xi32>
    %137 = arith.addi %6, %136 : vector<16x16xi32>
    %c16_i32_95 = arith.constant 16 : i32
    %138 = vector.broadcast %c16_i32_95 : i32 to vector<16x16xi32>
    %139 = arith.cmpi slt, %137, %138 : vector<16x16xi32>
    %140 = arith.andi %135, %139 : vector<16x16xi1>
    %c13_i32 = arith.constant 13 : i32
    %141 = tpu.dynamic_rotate %2 by %c13_i32 dim 0 : vector<16x16xf32>, i32 -> vector<16x16xf32>
    %cst_96 = arith.constant 0.000000e+00 : f32
    %142 = vector.broadcast %cst_96 : f32 to vector<16x16xf32>
    %143 = arith.select %140, %141, %142 : vector<16x16xi1>, vector<16x16xf32>
    %c13_i32_97 = arith.constant 13 : i32
    %144 = tpu.dynamic_rotate %5 by %c13_i32_97 dim 0 : vector<16x16xf32>, i32 -> vector<16x16xf32>
    %cst_98 = arith.constant 0.000000e+00 : f32
    %145 = vector.broadcast %cst_98 : f32 to vector<16x16xf32>
    %146 = arith.select %140, %144, %145 : vector<16x16xi1>, vector<16x16xf32>
    %c0_99 = arith.constant 0 : index
    %c6 = arith.constant 6 : index
    %c0_100 = arith.constant 0 : index
    %c0_101 = arith.constant 0 : index
    %147 = vector.load %arg2[%c0_99, %c6, %c0_100, %c0_101] : memref<2x7x16x16xf32, #tpu.memory_space<vmem>>, vector<1x1x16x16xf32>
    %148 = vector.shape_cast %147 : vector<1x1x16x16xf32> to vector<16x16xf32>
    %cst_102 = arith.constant dense<0.000000e+00> : vector<16x16xf32>
    %149 = tpu.matmul %143, %148, %cst_102 {dimension_numbers = #tpu.dot_dimension_numbers<[1], [0], [0], [1], [0, 0, 1, 1], [], []>, precision = #tpu.contract_precision<fp32>} : vector<16x16xf32>, vector<16x16xf32>, vector<16x16xf32> -> vector<16x16xf32>
    %150 = arith.addf %127, %149 : vector<16x16xf32>
    %c1_103 = arith.constant 1 : index
    %c6_104 = arith.constant 6 : index
    %c0_105 = arith.constant 0 : index
    %c0_106 = arith.constant 0 : index
    %151 = vector.load %arg2[%c1_103, %c6_104, %c0_105, %c0_106] : memref<2x7x16x16xf32, #tpu.memory_space<vmem>>, vector<1x1x16x16xf32>
    %152 = vector.shape_cast %151 : vector<1x1x16x16xf32> to vector<16x16xf32>
    %cst_107 = arith.constant dense<0.000000e+00> : vector<16x16xf32>
    %153 = tpu.matmul %146, %152, %cst_107 {dimension_numbers = #tpu.dot_dimension_numbers<[1], [0], [0], [1], [0, 0, 1, 1], [], []>, precision = #tpu.contract_precision<fp32>} : vector<16x16xf32>, vector<16x16xf32>, vector<16x16xf32> -> vector<16x16xf32>
    %154 = arith.addf %131, %153 : vector<16x16xf32>
    %155 = arith.addf %150, %154 : vector<16x16xf32>
    %c0_108 = arith.constant 0 : index
    %156 = memref.load %arg1[%c0_108] : memref<1xf32, #tpu.memory_space<smem>>
    %157 = vector.broadcast %156 : f32 to vector<16x16xf32>
    %158 = arith.addf %155, %157 : vector<16x16xf32>
    %159 = arith.negf %158 : vector<16x16xf32>
    %160 = math.exp %159 : vector<16x16xf32>
    %cst_109 = arith.constant 1.000000e+00 : f32
    %161 = vector.broadcast %cst_109 : f32 to vector<16x16xf32>
    %162 = arith.addf %161, %160 : vector<16x16xf32>
    %163 = arith.divf %161, %162 : vector<16x16xf32>
    %c0_110 = arith.constant 0 : index
    %c0_111 = arith.constant 0 : index
    %c0_112 = arith.constant 0 : index
    %164 = vector.load %arg4[%c0_110, %c0_111, %c0_112] : memref<1x16x16xf32, #tpu.memory_space<vmem>>, vector<1x16x16xf32>
    %165 = vector.shape_cast %164 : vector<1x16x16xf32> to vector<16x16xf32>
    %166 = vector.shape_cast %163 : vector<16x16xf32> to vector<1x16x16xf32>
    tpu.vector_store %arg4[%c0_110, %c0_111, %c0_112], %166 {strides = array<i32>} : memref<1x16x16xf32, #tpu.memory_space<vmem>>, vector<1x16x16xf32>,
    return
  }
  func.func @transform_0(%arg0: i32, %arg1: memref<1xf32, #tpu.memory_space<smem>>) -> (i32, i32, i32, i32) {
    %c0_i32 = arith.constant 0 : i32
    %c0_i32_0 = arith.constant 0 : i32
    %c0_i32_1 = arith.constant 0 : i32
    %c0_i32_2 = arith.constant 0 : i32
    %c0_i32_3 = arith.constant 0 : i32
    return %c0_i32, %c0_i32_0, %c0_i32_1, %c0_i32_2 : i32, i32, i32, i32
  }
  func.func @transform_1(%arg0: i32, %arg1: memref<1xf32, #tpu.memory_space<smem>>) -> (i32, i32, i32, i32) {
    %c0_i32 = arith.constant 0 : i32
    %c0_i32_0 = arith.constant 0 : i32
    %c0_i32_1 = arith.constant 0 : i32
    %c0_i32_2 = arith.constant 0 : i32
    return %arg0, %c0_i32, %c0_i32_0, %c0_i32_1 : i32, i32, i32, i32
  }
  func.func @transform_2(%arg0: i32, %arg1: memref<1xf32, #tpu.memory_space<smem>>) -> (i32, i32, i32) {
    %c0_i32 = arith.constant 0 : i32
    %c0_i32_0 = arith.constant 0 : i32
    %c0_i32_1 = arith.constant 0 : i32
    return %arg0, %c0_i32, %c0_i32_0 : i32, i32, i32
  }
}

</mosaic_0001>

<bundles_post_ra>
// kernel: _spatial_gate_impl.3
= control target key start
LH: loop header
LB: loop body
LE: loop exit
PB: predicated region body
PF: predicated region fallthrough
CT: control target
= control target key end

     0   :  { %s393_s9 = smov 0   ;;  %s395_s10 = smov 0   ;;  %s426_s0 = inlined_call_operand.vmem [shape: f32[2,4,256], index: 0, kind: input, shape index: {}, may-alias: {0,2}]   ;;  %s427_s1 = inlined_call_operand.vmem [shape: f32[2,1,256], index: 1, kind: input, shape index: {}]   ;;  %s428_s2 = inlined_call_operand.vmem [shape: f32[2,4,256], index: 2, kind: output, shape index: {}, may-alias: {0,2}]  }
   0x1   :  { %s397_s11 = smov 0  }
   0x2 LB: > { %s24_s12 = sadd.s32 1, %s372_s10  ;;  %p320_p0 = scmp.ge.s32.totalorder %s376_s11, 1  ;;  %s376_s11 = sphi %s397_s11, %s12_s11   ;;  %s372_s10 = sphi %s395_s10, %s430_s10   ;;  %s368_s9 = sphi %s393_s9, %s429_s9  }
   0x3   : > { %p26_p1 = scmp.ge.s32.totalorder %s24_s12, 2  ;;  %p141_p2 = scmp.lt.s32.totalorder %s376_s11, 3 }
   0x5   : > { %s432_s12 = smov (%p26_p1, %s24_s12), 0  ;;  %p142_p3 = pnand %p320_p0, %p141_p2 }
   0x6   : > { %p175_p4 = scmp.lt.s32.totalorder (!%p142_p3), %s368_s9, 1 }
   0x7   : > { %145 = sbr.rel (%p142_p3) target bundleno = 25 (0x19), region = 28 }
   0xc   : > { %v200_v0 = vlaneseq  ;;  %s434_s9 = smov (!%p175_p4, %s368_s9), 1 }
   0xd   : > { %s328_s13 = sshll.u32 %s434_s9, 3  ;;  %s323_s14 = sshll.u32 %s434_s9, 1 }
   0xe   : > { %v201_v1 = vshrl.u32 %v200_v0, 7  ;;  %s183_s17 = scalar_lea.vmem %s426_s0, %s328_s13  ;;  %s187_s20 = scalar_lea.vmem %s427_s1, %s323_s14 }
   0xf   : > { %v197_v4 = vld [vmem:[%s187_s20] sm:$0x3]  ;;  %s196_s23 = scalar_lea.vmem %s428_s2, %s328_s13 }
  0x10   : > { %v202_v2 = vsub.s32 0, %v201_v1  ;;  %v206_v3 = vsub.s32 1, %v201_v1  ;;  %v198_v7 = vld [vmem:[%s183_s17] sm:$0xff] }
  0x12   : > { %v203_v5 = vrot.slane %v197_v4, %v202_v2  ;;  %v207_v6 = vrot.slane %v197_v4, %v206_v3 }
  0x14   : > { %v208_v8 = vcombine.low %v203_v5, %v207_v6 }
  0x16   : > { %v210_v9 = vmul.f32 %v208_v8, %v198_v7 }
  0x18   : > { %211 = vst [vmem:[%s196_s23] sm:$0xff] %v210_v9 }
  0x19 PF: > { %s12_s11 = sadd.s32 1, %s376_s11   ;;  %s429_s9 = smov %s372_s10 }
  0x1a   : > { %p9_p5 = scmp.ge.s32.totalorder %s12_s11, 4   ;;  %s430_s10 = smov %s432_s12 }
  0x1c   :  { %11 = sbr.rel (!%p9_p5) target bundleno = 2 (0x2), region = 61 }

// kernel: _spatial_gate_impl.2
= control target key start
LH: loop header
LB: loop body
LE: loop exit
PB: predicated region body
PF: predicated region fallthrough
CT: control target
= control target key end

     0   :  { %s10087_s0 = inlined_call_operand.<no memory space> [shape: f32[1], index: 0, kind: input, shape index: {}]   ;;  %s10088_s1 = inlined_call_operand.hbm [shape: f32[2,7,16,16], index: 1, kind: input, shape index: {}]   ;;  %s10089_s2 = inlined_call_operand.hbm [shape: f32[2,4,16,16], index: 2, kind: input, shape index: {}]   ;;  %s10090_s3 = inlined_call_operand.vmem [shape: f32[2,16,16], index: 3, kind: output, shape index: {}]  }
   0x1   :  { %8 = sst [smem:[#allocation3]] %s10087_s0 }
   0x2   :  { %9 = vsyncpa [#allocation5], 0 }
   0x3   :  { %10 = vsyncpa [#allocation7], 0 }
   0x4   :  { %12 = vsyncpa [#allocation7 + $0x1], 0  ;;  %s8745_s14 = smov 0   ;;  %s8747_s15 = smov 0  }
   0x5   :  { %s8749_s16 = smov 0   ;;  %s8751_s17 = smov 0  }
   0x6 LB: > { %s8764_s0 = sadd.s32 4294967295, %s8716_s17   ;;  %p59_p0 = scmp.ne.s32.totalorder %s8708_s15, %s8704_s14  ;;  %s8716_s17 = sphi %s8751_s17, %s10133_s17   ;;  %s8712_s16 = sphi %s8749_s16, %s10132_s16   ;;  %s8708_s15 = sphi %s8747_s15, %s10131_s15   ;;  %s8704_s14 = sphi %s8745_s14, %s10130_s14  }
   0x7   : > { %p10091_p1 = scmp.eq.s32.totalorder %s8764_s0, 0  ;;  %p7623_p2 = scmp.ge.s32.totalorder %s8716_s17, 1 }
   0x8   : > { %p96_p3 = scmp.lt.s32.totalorder %s8716_s17, 3  ;;  %s8718_s20 = smov [#allocation4]  }
   0x9   : > { %p8772_p4 = por %p10091_p1, %p59_p0  ;;  %s108_s21 = sshll.u32 %s8718_s20, 4  ;;  %s109_s21 = int_to_ptr.vmem [resolvable:$true] %s108_s21 }
   0xa   : > { %p8776_p5 = pnand %p7623_p2, %p96_p3  ;;  %s8789_s23 = sadd.s32 1, %s8716_s17  }
   0xb   : > { %s10094_s18 = scalar_select %p8772_p4, 1, 0 }
   0xc   : > { %s10095_s19 = scalar_select %p8776_p5, 1, 0 }
   0xd   : > { %p8570_p6 = pneg %p8776_p5  ;;  %s46_s24 = sadd.s32 1, %s8712_s16 }
   0xe   : > { %s43_s25 = ssub.s32 %s8716_s17, %s8789_s23  ;;  %s8635_s26 = scalar_lea.vmem %s109_s21, 3584 }
   0xf   : > { %p8784_p7 = pnand %p8570_p6, %p10091_p1  ;;  %p8636_p9 = scmp.ne.s32.totalorder %s109_s21, %s8635_s26 }
  0x10   : > { %p8643_p12 = scmp.lt.s32.totalorder %s109_s21, %s109_s21  ;;  %p8644_p13 = scmp.lt.s32.totalorder %s8635_s26, %s8635_s26 }
  0x11   : > { %p8626_p8 = pneg %p8784_p7 }
  0x12   : > { %p8645_p0 = por %p8644_p13, %p8643_p12 }
  0x13   : > { %p8638_p10 = pnand %p8636_p9, %p8626_p8 }
  0x15   : > { %p8639_p11 = pneg %p8638_p10 }
  0x17   : > { %p8646_p2 = pnand %p8645_p0, %p8639_p11 }
  0x19   : > { %8649 = shalt.err (!%p8646_p2)
}
  0x1a   : > { %s8719_s27 = smov 128   ;;  %s8720_s28 = smov 8  }
  0x1b   : > { %8573 = dma.hbm_to_vmem [thread:$0]  (!%p8784_p7), %s10088_s1, 3584, %s109_s21, [#allocation5], %s8719_s27, %s8719_s27, %s8720_s28  }
  0x1c   : > { %p44_p3 = scmp.eq.s32.totalorder %s43_s25, 0  ;;  %p53_p6 = scmp.ne.s32.totalorder %s8712_s16, %s8708_s15 }
  0x1d   : > { %p54_p8 = scmp.eq.s32.totalorder %s8716_s17, 0  ;;  %p8579_p9 = scmp.lt.s32.totalorder %s8716_s17, 2 }
  0x1e   : > { %s8809_s4 = scalar_select %p44_p3, %s8712_s16, %s46_s24  }
  0x1f   : > { %p55_p10 = por %p54_p8, %p53_p6  ;;  %s122_s5 = sand.u32 1, %s8712_s16  }
  0x20   : > { %s7626_s6 = sshll.u32 %s122_s5, 6  ;;  %s7638_s7 = sshll.u32 %s8716_s17, 10 }
  0x21   : > { %s8816_s10 = scalar_lea.hbm %s10089_s2, %s7638_s7  ;;  %s126_s11 = scalar_lea.vmem [#allocation6], %s7626_s6 }
  0x22   : > { %s133_s12 = sshll.u32 %s126_s11, 4  ;;  %p8820_p7 = pnand %p8579_p9, %p55_p10  ;;  %s8818_s12 = int_to_ptr.vmem [resolvable:$true] %s133_s12 }
  0x23   : > { %s8824_s14 = scalar_lea.sflag [#allocation7], %s122_s5  ;;  %s8650_s17 = scalar_lea.hbm %s8816_s10, 1024 }
  0x24   : > { %p8651_p11 = scmp.ne.s32.totalorder %s8816_s10, %s8650_s17  ;;  %p8652_p12 = pneg %p8820_p7 }
  0x25   : > { %s8655_s22 = scalar_lea.hbm %s10089_s2, 2048  ;;  %p8656_p2 = scmp.lt.s32.totalorder %s8816_s10, %s10089_s2 }
  0x26   : > { %p8653_p13 = pnand %p8652_p12, %p8651_p11  ;;  %p8657_p3 = scmp.lt.s32.totalorder %s8655_s22, %s8650_s17 }
  0x28   : > { %p8654_p0 = pneg %p8653_p13  ;;  %p8658_p6 = por %p8657_p3, %p8656_p2 }
  0x2a   : > { %p8659_p8 = pnand %p8658_p6, %p8654_p0 }
  0x2c   : > { %8662 = shalt.err (!%p8659_p8)
}
  0x2d   : > { %s8663_s26 = scalar_lea.vmem %s8818_s12, 1024  ;;  %s8721_s29 = smov [#allocation6]  }
  0x2e   : > { %p8664_p9 = scmp.ne.s32.totalorder %s8818_s12, %s8663_s26  ;;  %s8668_s30 = sshll.u32 %s8721_s29, 4  ;;  %s8669_s30 = int_to_ptr.vmem [resolvable:$false] %s8668_s30 }
  0x2f   : > { %s8670_s5 = scalar_lea.vmem %s8669_s30, 2048  ;;  %p8671_p13 = scmp.lt.s32.totalorder %s8818_s12, %s8669_s30 }
  0x30   : > { %p8666_p10 = pnand %p8664_p9, %p8652_p12  ;;  %p8672_p1 = scmp.lt.s32.totalorder %s8670_s5, %s8663_s26 }
  0x32   : > { %p8667_p11 = pneg %p8666_p10  ;;  %p8673_p4 = por %p8672_p1, %p8671_p13 }
  0x34   : > { %p8674_p5 = pnand %p8673_p4, %p8667_p11 }
  0x36   : > { %8677 = shalt.err (!%p8674_p5)
}
  0x37   : > { %8577 = dma.hbm_to_vmem [thread:$0]  (!%p8820_p7), %s8816_s10, 1024, %s8818_s12, %s8824_s14, %s8719_s27, %s8719_s27, %s8720_s28  }
  0x38   : > { %p10098_p12 = scmp.ne.s32.totalorder %s10095_s19, 0 }
  0x3a   : > { %145 = sbr.rel (%p10098_p12) target bundleno = 575 (0x23f), region = 28 }
  0x3f   : > { %p10099_p0 = scmp.eq.s32.totalorder %s8764_s0, 0 }
  0x41   : > { %8695 = dma.done.wait (%p10099_p0), [#allocation5], 3584   ;;  %p10100_p2 = pmov %p10099_p0 }
  0x42   : > { %s151_s6 = sand.u32 1, %s8708_s15   ;;  %p10101_p1 = scmp.ne.s32.totalorder %s10094_s18, 0 }
  0x43   : > { %8697 = vsyncadd (%p10100_p2), [#allocation5], 4294963712  ;;  %s7631_s7 = sshll.u32 %s151_s6, 6  ;;  %s152_s8 = scalar_lea.sflag [#allocation7], %s151_s6 }
  0x44   : > { %s155_s9 = scalar_lea.vmem [#allocation6], %s7631_s7 }
  0x45   : > { %8699 = dma.done.wait (%p10101_p1), %s152_s8, 1024  }
  0x46   : > { %8701 = vsyncadd (%p10101_p1), %s152_s8, 4294966272  ;;  %v221_v0 = vlaneseq  ;;  %vm189_vm0 = vcmask 130048   ;;  %v273_v3 = vld [vmem:[#allocation4 + $0x18] sm:$0xff]  ;;  %v272_v4 = vld [vmem:[#allocation4 + $0x10] sm:$0xff]  ;;  %s10055_s18 = sld [smem:[#allocation3]]  ;;  %p176_p4 = scmp.lt.s32.totalorder %s8764_s0, 1 }
  0x47   : > { %v181_v5 = vld [vmem:[%s155_s9] sm:$0xff]  ;;  %v8867_v7 = vand.u32 4294901760, %v273_v3  ;;  %v8869_v8 = vand.u32 4294901760, %v272_v4  ;;  %v182_v9 = vld [vmem:[%s155_s9 + $0x8] sm:$0xff]  ;;  %v183_v10 = vld [vmem:[%s155_s9 + $0x10] sm:$0xff] }
  0x48   : > { %v8859_v1 = vshrl.u32 %v221_v0, 7  ;;  %v184_v11 = vld [vmem:[%s155_s9 + $0x18] sm:$0xff]  ;;  %v190_v12 = vsel %vm189_vm0, %v181_v5, -inf  ;;  %v185_v13 = vld [vmem:[%s155_s9 + $0x20] sm:$0xff]  ;;  %v186_v14 = vld [vmem:[%s155_s9 + $0x28] sm:$0xff]  ;;  %v191_v16 = vsel %vm189_vm0, %v183_v10, -inf }
  0x49   : > { %v187_v15 = vld [vmem:[%s155_s9 + $0x30] sm:$0xff]  ;;  %v197_v17 = vsel %vm189_vm0, %v182_v9, -inf  ;;  %v198_v18 = vsel %vm189_vm0, %v184_v11, -inf  ;;  %7976 = vmatprep.subr.mxu0 %v8867_v7  ;;  %v8879_v19 = vsub.f32 %v273_v3, %v8867_v7  ;;  %v8882_v20 = vsub.f32 %v272_v4, %v8869_v8  ;;  %v188_v21 = vld [vmem:[%s155_s9 + $0x38] sm:$0xff]  ;;  %v246_v40 = vld [vmem:[#allocation4 + $0x8] sm:$0xff]  ;;  %s10135_s0 = smov (!%p176_p4, %s8764_s0), 1 }
  0x4a   : > { %v8862_v2 = vadd.s32 4294967294, %v8859_v1  ;;  %v8865_v6 = vadd.s32 4294967293, %v8859_v1  ;;  %vm260_vm1 = vcmp.lt.s32.totalorder %v8859_v1, 2  ;;  %v192_v22 = vsel %vm189_vm0, %v185_v13, -inf  ;;  %7977 = vmatpush3.msra.mxu0 %v8867_v7  ;;  %v245_v45 = vld [vmem:[#allocation4] sm:$0xff]  ;;  %s7639_s19 = sshll.u32 %s10135_s0, 4 }
  0x4b   : > { %v194_v23 = vsel %vm189_vm0, %v187_v15, -inf  ;;  %v193_v24 = vmax.f32 %v190_v12, %v192_v22  ;;  %v199_v26 = vsel %vm189_vm0, %v186_v14, -inf  ;;  %v201_v27 = vsel %vm189_vm0, %v188_v21, -inf  ;;  %7978 = vmatprep.subr.mxu0 %v8869_v8  ;;  %s180_s10 = scalar_lea.vmem %s10090_s3, %s7639_s19 }
  0x4c   : > { %vm252_vm2 = vcmp.ge.s32.totalorder %v8862_v2, 0  ;;  %v195_v25 = vmax.f32 %v191_v16, %v194_v23  ;;  %vm234_vm3 = vcmp.lt.s32.totalorder %v8859_v1, 3  ;;  %v8891_v28 = vand.u32 4294901760, %v8879_v19  ;;  %7979 = vmatpush3.msra.mxu0 %v8869_v8 }
  0x4d   : > { %v8895_v29 = vand.u32 4294901760, %v8882_v20  ;;  %v200_v30 = vmax.f32 %v197_v17, %v199_v26  ;;  %v202_v31 = vmax.f32 %v198_v18, %v201_v27  ;;  %v204_v33 = vsel %vm189_vm0, %v181_v5, 0.0  ;;  %7990 = vmatprep.subr.mxu0 %v8879_v19 }
  0x4e   : > { %v8898_v32 = vmax.f32 %v193_v24, %v195_v25  ;;  %v205_v34 = vsel %vm189_vm0, %v183_v10, 0.0  ;;  %v207_v35 = vsel %vm189_vm0, %v185_v13, 0.0  ;;  %v399_v36 = vsub.f32 %v8879_v19, %v8891_v28 }
  0x4f   : > { %v406_v37 = vsub.f32 %v8882_v20, %v8895_v29  ;;  %v8907_v38 = vmax.f32 %v200_v30, %v202_v31  ;;  %v206_v39 = vadd.f32 %v205_v34, %v204_v33  ;;  %v209_v41 = vsel %vm189_vm0, %v187_v15, 0.0 }
  0x50   : > { %v211_v42 = vsel %vm189_vm0, %v182_v9, 0.0  ;;  %v212_v43 = vsel %vm189_vm0, %v184_v11, 0.0  ;;  %v214_v44 = vsel %vm189_vm0, %v186_v14, 0.0  ;;  %v400_v46 = vand.u32 4294901760, %v399_v36 }
  0x51   : > { %v407_v47 = vand.u32 4294901760, %v406_v37  ;;  %v208_v48 = vadd.f32 %v207_v35, %v206_v39  ;;  %v213_v49 = vadd.f32 %v212_v43, %v211_v42  ;;  %v216_v50 = vsel %vm189_vm0, %v188_v21, 0.0 }
  0x52   : > { %v258_v51 = vrot.slane %v8898_v32, 6  ;;  %v259_v52 = vrot.slane %v8907_v38, 6  ;;  %v8917_v53 = vand.u32 4294901760, %v246_v40  ;;  %7983 = vmatprep.subr.mxu1 %v400_v46  ;;  %v8919_v56 = vand.u32 4294901760, %v245_v45 }
  0x53   : > { %v210_v54 = vadd.f32 %v209_v41, %v208_v48  ;;  %v215_v55 = vadd.f32 %v214_v44, %v213_v49  ;;  %v232_v57 = vrot.slane %v8898_v32, 5  ;;  %7984 = vmatpush3.msra.mxu1 %v400_v46  ;;  %v233_v61 = vrot.slane %v8907_v38, 5 }
  0x54   : > { %v262_v58 = vsel %vm260_vm1, %v259_v52, %v258_v51  ;;  %v261_v59 = vsel %vm260_vm1, %v258_v51, %v259_v52  ;;  %v8927_v60 = vsub.f32 %v246_v40, %v8917_v53  ;;  %7985 = vmatprep.subr.mxu1 %v407_v47  ;;  %vm226_vm4 = vcmp.ge.s32.totalorder %v8865_v6, 0 }
  0x55   : > { %v217_v62 = vadd.f32 %v216_v50, %v215_v55  ;;  %v263_v63 = vsel %vm252_vm2, %v262_v58, 0.0  ;;  %v278_v0 = vsel %vm189_vm0, %v261_v59, 0  ;;  %7986 = vmatpush3.msra.mxu1 %v407_v47  ;;  %v8937_v5 = vmul.f32 0.25, %v210_v54  ;;  %v1291_v47 = vld [vmem:[#allocation4 + $0x80] sm:$0xff] }
  0x56   : > { %v275_v3 = vsel %vm189_vm0, %v263_v63, 0  ;;  %v8935_v4 = vand.u32 4294901760, %v278_v0  ;;  %7997 = vmatprep.subr.mxu1 %v8867_v7  ;;  %v236_v10 = vsel %vm234_vm3, %v233_v61, %v232_v57  ;;  %v8944_v12 = vand.u32 4294901760, %v8927_v60 }
  0x57   : > { %v347_v9 = vand.u32 4294901760, %v275_v3  ;;  %v8947_v13 = vsub.f32 %v245_v45, %v8919_v56  ;;  %v237_v14 = vsel %vm226_vm4, %v236_v10, 0.0  ;;  %v8951_v15 = vmul.f32 0.25, %v217_v62 }
  0x58   : > { %v358_v11 = vsub.f32 %v278_v0, %v8935_v4  ;;  %v783_v17 = vsel %vm189_vm0, %v237_v14, 0  ;;  %v235_v18 = vsel %vm234_vm3, %v232_v57, %v233_v61  ;;  %v907_v26 = vsub.f32 %v8927_v60, %v8944_v12  ;;  %v248_v14 = vld [vmem:[#allocation4 + $0x70] sm:$0xff] }
  0x59   : > { %v348_v16 = vsub.f32 %v275_v3, %v347_v9  ;;  %7987 = vmatprep.mubr.f32.mxu1 %v347_v9  ;;  %v8957_v22 = vand.u32 4294901760, %v783_v17  ;;  %v786_v24 = vsel %vm189_vm0, %v235_v18, 0  ;;  %v8965_v27 = vand.u32 4294901760, %v8947_v13 }
  0x5a   : > { %v359_v21 = vand.u32 4294901760, %v358_v11  ;;  %7988 = vmatmul.mubr.f32.vlgmr.msra.gmra.mxu1 %v8935_v4  ;;  %v265_v31 = vrot.slane %v8937_v5, 6  ;;  %v266_v33 = vrot.slane %v8951_v15, 6  ;;  %v8973_v35 = vand.u32 4294901760, %v786_v24 }
  0x5b   : > { %v349_v23 = vand.u32 4294901760, %v348_v16  ;;  %7998 = vmatpush3.msra.mxu1 %v8867_v7  ;;  %v8968_v30 = vsub.f32 %v783_v17, %v8957_v22  ;;  %v908_v41 = vand.u32 4294901760, %v907_v26  ;;  %v914_v42 = vsub.f32 %v8947_v13, %v8965_v27 }
  0x5c   : > { %v360_v25 = vsub.f32 %v358_v11, %v359_v21  ;;  %7999 = vmatprep.subr.mxu1 %v8869_v8  ;;  %v8979_v40 = vsub.f32 %v786_v24, %v8973_v35  ;;  %v268_v43 = vsel %vm260_vm1, %v266_v33, %v265_v31  ;;  %v267_v48 = vsel %vm260_vm1, %v265_v31, %v266_v33 }
  0x5d   : > { %v350_v34 = vsub.f32 %v348_v16, %v349_v23  ;;  %8000 = vmatpush3.msra.mxu1 %v8869_v8  ;;  %8001 = vmatprep.mubr.f32.mxu1 %v349_v23  ;;  %v857_v39 = vand.u32 4294901760, %v8968_v30  ;;  %v269_v45 = vsel %vm252_vm2, %v268_v43, 0.0  ;;  %v915_v46 = vand.u32 4294901760, %v914_v42 }
  0x5e   : > { %v361_v36 = vand.u32 4294901760, %v360_v25  ;;  %8002 = vmatmul.mubr.f32.vlgmr.msra.gmra.mxu1 %v359_v21  ;;  %8011 = vmatprep.subr.mxu1 %v8867_v7  ;;  %v1294_v50 = vsel %vm189_vm0, %v269_v45, 0  ;;  %v1297_v51 = vsel %vm189_vm0, %v267_v48, 0  ;;  %v239_v59 = vrot.slane %v8937_v5, 5 }
  0x5f   : > { %v351_v37 = vand.u32 4294901760, %v350_v34  ;;  %8012 = vmatpush3.msra.mxu1 %v8867_v7  ;;  %8015 = vmatprep.mubr.f32.mxu1 %v347_v9  ;;  %v867_v7 = vand.u32 4294901760, %v8979_v40  ;;  %v858_v44 = vsub.f32 %v8968_v30, %v857_v39  ;;  %v9012_v52 = vand.u32 4294901760, %v1294_v50 }
  0x60   : > { %8013 = vmatprep.subr.mxu1 %v8869_v8  ;;  %v240_v61 = vrot.slane %v8951_v15, 5  ;;  %v9088_v21 = vand.u32 4294901760, %v248_v14  ;;  %v9115_v33 = vadd.s32 4294967295, %v8859_v1  ;;  %v2317_v34 = vrot.slane %v8898_v32, 7 }
  0x61   : > { %7980 = vmatprep.mubr.f32.mxu0 %v351_v37  ;;  %8014 = vmatpush3.msra.mxu1 %v8869_v8  ;;  %v1292_v8 = vld [vmem:[#allocation4 + $0x88] sm:$0xff]  ;;  %v859_v2 = vand.u32 4294901760, %v858_v44  ;;  %v9029_v57 = vsub.f32 %v1294_v50, %v9012_v52  ;;  %vm2319_vm5 = vcmp.lt.s32.totalorder %v8859_v1, 1  ;;  %vm4392_vm7 = vcmp.lt.s32.totalorder %v8859_v1, 7 }
  0x62   : > { %7981 = vmatmul.mubr.f32.vlgmr.msra.gmra.mxu0 %v361_v36  ;;  %8016 = vmatmul.mubr.f32.vlgmr.msra.gmra.mxu1 %v8935_v4  ;;  %v9002_v49 = vand.u32 4294901760, %v1292_v8  ;;  %v242_v3 = vsel %vm234_vm3, %v240_v61, %v239_v59  ;;  %vm2311_vm6 = vcmp.ge.s32.totalorder %v9115_v33, 0  ;;  %v2332_v44 = vld [vmem:[#allocation4 + $0x28] sm:$0xff]  ;;  %vm5439_vm9 = vcmp.lt.s32.totalorder %v8859_v1, 6 }
  0x63   : > { %7991 = vmatpush3.msra.mxu0 %v8879_v19  ;;  %7994 = vmatprep.mubr.f32.mxu0 %v348_v16  ;;  %v868_v19 = vsub.f32 %v8979_v40, %v867_v7  ;;  %v1368_v63 = vand.u32 4294901760, %v9029_v57  ;;  %v241_v16 = vsel %vm234_vm3, %v239_v59, %v240_v61  ;;  %v2324_v59 = vrot.slane %v8937_v5, 7 }
  0x64   : > { %7992 = vmatprep.subr.mxu0 %v8882_v20  ;;  %8025 = vmatprep.subr.mxu1 %v908_v41  ;;  %v9016_v54 = vsub.f32 %v1292_v8, %v9002_v49  ;;  %v1805_v23 = vsel %vm189_vm0, %v241_v16, 0  ;;  %v2325_v61 = vrot.slane %v8951_v15, 7  ;;  %vm6486_vm11 = vcmp.lt.s32.totalorder %v8859_v1, 5 }
  0x65   : > { %7993 = vmatpush3.msra.mxu0 %v8882_v20  ;;  %8026 = vmatpush3.msra.mxu1 %v908_v41  ;;  %v9007_v20 = vand.u32 4294901760, %v1291_v47  ;;  %v1369_v10 = vsub.f32 %v9029_v57, %v1368_v63  ;;  %v9098_v26 = vand.u32 4294901760, %v1805_v23 }
  0x66   : > { %8004 = vmatprep.subr.mxu0 %v8891_v28  ;;  %7995 = vmatmul.mubr.f32.vlgmr.msra.gmra.mxu0 %v358_v11  ;;  %v9034_v58 = vand.u32 4294901760, %v9016_v54  ;;  %v249_v11 = vld [vmem:[#allocation4 + $0x78] sm:$0xff]  ;;  %v2326_v16 = vsel %vm2319_vm5, %v2324_v59, %v2325_v61 }
  0x67   : > { %8005 = vmatpush3.msra.mxu0 %v8891_v28  ;;  %8008 = vmatprep.mubr.f32.mxu0 %v347_v9  ;;  %v869_v28 = vand.u32 4294901760, %v868_v19  ;;  %v9025_v55 = vsub.f32 %v1291_v47, %v9007_v20  ;;  %v9082_v17 = vand.u32 4294901760, %v249_v11  ;;  %v9122_v36 = vsub.f32 %v1805_v23, %v9098_v26  ;;  %v2331_v19 = vld [vmem:[#allocation4 + $0x20] sm:$0xff] }
  0x68   : > { %8006 = vmatprep.subr.mxu0 %v8895_v29  ;;  %8027 = vmatprep.subr.mxu1 %v915_v46  ;;  %v1418_v0 = vsub.f32 %v9016_v54, %v9034_v58  ;;  %v2850_v23 = vsel %vm189_vm0, %v2326_v16, 0 }
  0x69   : > { %8007 = vmatpush3.msra.mxu0 %v8895_v29  ;;  %8028 = vmatpush3.msra.mxu1 %v915_v46  ;;  %v9020_v29 = vand.u32 4294901760, %v1297_v51  ;;  %v9096_v25 = vsub.f32 %v249_v11, %v9082_v17  ;;  %v1886_v42 = vand.u32 4294901760, %v9122_v36  ;;  %v2845_v11 = vld [vmem:[#allocation4 + $0x98] sm:$0xff] }
  0x6a   : > { %8018 = vmatprep.subr.mxu0 %v8917_v53  ;;  %8009 = vmatmul.mubr.f32.vlgmr.msra.gmra.mxu0 %v8935_v4 }
  0x6b   : > { %8019 = vmatpush3.msra.mxu0 %v8917_v53  ;;  %8022 = vmatprep.mubr.f32.mxu0 %v859_v2  ;;  %v9041_v62 = vsub.f32 %v1297_v51, %v9020_v29  ;;  %v9112_v31 = vand.u32 4294901760, %v9096_v25  ;;  %v1887_v8 = vsub.f32 %v9122_v36, %v1886_v42  ;;  %v9167_v2 = vand.u32 4294901760, %v2332_v44 }
  0x6c   : > { %8020 = vmatprep.subr.mxu0 %v8919_v56  ;;  %8029 = vmatprep.mubr.f32.mxu1 %v8957_v22 }
  0x6d   : > { %8021 = vmatpush3.msra.mxu0 %v8919_v56  ;;  %8030 = vmatmul.mubr.f32.vlgmr.msra.gmra.mxu1 %v8973_v35  ;;  %v1378_v4 = vand.u32 4294901760, %v9041_v62 }
  0x6e   : > { %8032 = vmatprep.subr.mxu0 %v8927_v60  ;;  %8023 = vmatmul.mubr.f32.vlgmr.msra.gmra.mxu0 %v869_v28  ;;  %v1888_v28 = vand.u32 4294901760, %v1887_v8 }
  0x6f   : > { %8033 = vmatpush3.msra.mxu0 %v8927_v60  ;;  %8039 = vmatprep.subr.mxu1 %v8917_v53  ;;  %v9046_v60 = vand.u32 4294901760, %v9025_v55 }
  0x70   : > { %8034 = vmatprep.subr.mxu0 %v8947_v13  ;;  %8040 = vmatpush3.msra.mxu1 %v8917_v53 }
  0x71   : > { %8035 = vmatpush3.msra.mxu0 %v8947_v13  ;;  %8041 = vmatprep.subr.mxu1 %v8919_v56  ;;  %v1425_v9 = vsub.f32 %v9025_v55, %v9046_v60  ;;  %v243_v13 = vsel %vm226_vm4, %v242_v3, 0.0  ;;  %v2327_v3 = vsel %vm2319_vm5, %v2325_v61, %v2324_v59  ;;  %v3871_v61 = vld [vmem:[#allocation4 + $0xa8] sm:$0xff] }
  0x72   : > { %8036 = vmatprep.mubr.f32.mxu0 %v8968_v30  ;;  %8042 = vmatpush3.msra.mxu1 %v8919_v56  ;;  %v1802_v18 = vsel %vm189_vm0, %v243_v13, 0  ;;  %v2328_v13 = vsel %vm2311_vm6, %v2327_v3, 0.0  ;;  %v9381_v3 = vand.u32 4294901760, %v3871_v61 }
  0x73   : > { %8043 = vmatprep.mubr.f32.mxu1 %v857_v39  ;;  %8046 = vmatprep.subr.mxu0 %v8944_v12  ;;  %v1426_v6 = vand.u32 4294901760, %v1425_v9  ;;  %v9092_v24 = vand.u32 4294901760, %v1802_v18 }
  0x74   : > { %8037 = vmatmul.mubr.f32.vlgmr.msra.gmra.mxu0 %v8979_v40  ;;  %8044 = vmatmul.mubr.f32.vlgmr.msra.gmra.mxu1 %v867_v7  ;;  %v1926_v40 = vsub.f32 %v9096_v25, %v9112_v31 }
  0x75   : > { %8047 = vmatpush3.msra.mxu0 %v8944_v12  ;;  %8053 = vmatprep.subr.mxu1 %v8917_v53  ;;  %v1419_v12 = vand.u32 4294901760, %v1418_v0  ;;  %v9107_v30 = vsub.f32 %v1802_v18, %v9092_v24  ;;  %v2847_v18 = vsel %vm189_vm0, %v2328_v13, 0 }
  0x76   : > { %8048 = vmatprep.subr.mxu0 %v8965_v27  ;;  %8054 = vmatpush3.msra.mxu1 %v8917_v53  ;;  %v1379_v53 = vsub.f32 %v9041_v62, %v1378_v4  ;;  %v1927_v46 = vand.u32 4294901760, %v1926_v40 }
  0x77   : > { %8049 = vmatpush3.msra.mxu0 %v8965_v27  ;;  %8055 = vmatprep.subr.mxu1 %v8919_v56  ;;  %v9103_v27 = vsub.f32 %v248_v14, %v9088_v21  ;;  %v1876_v39 = vand.u32 4294901760, %v9107_v30  ;;  %v2844_v14 = vld [vmem:[#allocation4 + $0x90] sm:$0xff] }
  0x78   : > { %8050 = vmatprep.mubr.f32.mxu0 %v8957_v22  ;;  %8056 = vmatpush3.msra.mxu1 %v8919_v56  ;;  %v1370_v56 = vand.u32 4294901760, %v1369_v10 }
  0x79   : > { %8057 = vmatprep.mubr.f32.mxu1 %v8957_v22  ;;  %8060 = vmatprep.subr.mxu0 %v9002_v49  ;;  %v1380_v22 = vand.u32 4294901760, %v1379_v53  ;;  %v9128_v37 = vand.u32 4294901760, %v9103_v27  ;;  %v1877_v7 = vsub.f32 %v9107_v30, %v1876_v39 }
  0x7a   : > { %8051 = vmatmul.mubr.f32.vlgmr.msra.gmra.mxu0 %v8973_v35  ;;  %8058 = vmatmul.mubr.f32.vlgmr.msra.gmra.mxu1 %v8973_v35  ;;  %v2318_v35 = vrot.slane %v8907_v38, 7 }
  0x7b   : > { %8061 = vmatpush3.msra.mxu0 %v9002_v49  ;;  %8067 = vmatprep.subr.mxu1 %v1419_v12  ;;  %v1933_v43 = vsub.f32 %v9103_v27, %v9128_v37  ;;  %v1878_v50 = vand.u32 4294901760, %v1877_v7  ;;  %v3357_v7 = vld [vmem:[#allocation4 + $0x30] sm:$0xff] }
  0x7c   : > { %8062 = vmatprep.subr.mxu0 %v9007_v20  ;;  %8068 = vmatpush3.msra.mxu1 %v1419_v12  ;;  %v2321_v41 = vsel %vm2319_vm5, %v2318_v35, %v2317_v34  ;;  %v2320_v47 = vsel %vm2319_vm5, %v2317_v34, %v2318_v35 }
  0x7d   : > { %8063 = vmatpush3.msra.mxu0 %v9007_v20  ;;  %8069 = vmatprep.subr.mxu1 %v1426_v6  ;;  %v2322_v45 = vsel %vm2311_vm6, %v2321_v41, 0.0  ;;  %v1934_v48 = vand.u32 4294901760, %v1933_v43  ;;  %v2337_v51 = vsel %vm189_vm0, %v2320_v47, 0  ;;  %v3358_v41 = vld [vmem:[#allocation4 + $0x38] sm:$0xff]  ;;  %v3363_v47 = vsel %vm189_vm0, %v8907_v38, 0 }
  0x7e   : > { %8064 = vmatprep.mubr.f32.mxu0 %v1370_v56  ;;  %8070 = vmatpush3.msra.mxu1 %v1426_v6 }
  0x7f   : > { %8071 = vmatprep.mubr.f32.mxu1 %v9012_v52  ;;  %8074 = vmatprep.subr.mxu0 %v9016_v54 }
  0x80   : > { %8065 = vmatmul.mubr.f32.vlgmr.msra.gmra.mxu0 %v1380_v22  ;;  %8072 = vmatmul.mubr.f32.vlgmr.msra.gmra.mxu1 %v9020_v29 }
  0x81   : > { %8075 = vmatpush3.msra.mxu0 %v9016_v54  ;;  %8081 = vmatprep.subr.mxu1 %v9002_v49  ;;  %v9181_v54 = vsub.f32 %v2332_v44, %v9167_v2 }
  0x82   : > { %8076 = vmatprep.subr.mxu0 %v9025_v55  ;;  %8082 = vmatpush3.msra.mxu1 %v9002_v49 }
  0x83   : > { %8077 = vmatpush3.msra.mxu0 %v9025_v55  ;;  %8083 = vmatprep.subr.mxu1 %v9007_v20 }
  0x84   : > { %8078 = vmatprep.mubr.f32.mxu0 %v9029_v57  ;;  %8084 = vmatpush3.msra.mxu1 %v9007_v20 }
  0x85   : > { %8085 = vmatprep.mubr.f32.mxu1 %v1368_v63  ;;  %8088 = vmatprep.subr.mxu0 %v9034_v58 }
  0x86   : > { %8079 = vmatmul.mubr.f32.vlgmr.msra.gmra.mxu0 %v9041_v62  ;;  %8086 = vmatmul.mubr.f32.vlgmr.msra.gmra.mxu1 %v1378_v4 }
  0x87   : > { %8089 = vmatpush3.msra.mxu0 %v9034_v58  ;;  %8095 = vmatprep.subr.mxu1 %v9002_v49  ;;  %v9197_v58 = vand.u32 4294901760, %v9181_v54 }
  0x88   : > { %8090 = vmatprep.subr.mxu0 %v9046_v60  ;;  %8096 = vmatpush3.msra.mxu1 %v9002_v49  ;;  %v2334_v49 = vsel %vm189_vm0, %v2322_v45, 0  ;;  %v9311_v45 = vand.u32 4294901760, %v3358_v41 }
  0x89   : > { %8091 = vmatpush3.msra.mxu0 %v9046_v60  ;;  %8097 = vmatprep.subr.mxu1 %v9007_v20  ;;  %v2458_v0 = vsub.f32 %v9181_v54, %v9197_v58 }
  0x8a   : > { %8092 = vmatprep.mubr.f32.mxu0 %v9012_v52  ;;  %8098 = vmatpush3.msra.mxu1 %v9007_v20  ;;  %v9173_v20 = vand.u32 4294901760, %v2331_v19 }
  0x8b   : > { %8099 = vmatprep.mubr.f32.mxu1 %v9012_v52  ;;  %8102 = vmatprep.subr.mxu0 %v9082_v17  ;;  %v9177_v52 = vand.u32 4294901760, %v2334_v49  ;;  %v2459_v12 = vand.u32 4294901760, %v2458_v0 }
  0x8c   : > { %8093 = vmatmul.mubr.f32.vlgmr.msra.gmra.mxu0 %v9020_v29  ;;  %8100 = vmatmul.mubr.f32.vlgmr.msra.gmra.mxu1 %v9020_v29  ;;  %v9183_v29 = vand.u32 4294901760, %v2337_v51  ;;  %v9188_v55 = vsub.f32 %v2331_v19, %v9173_v20  ;;  %v9318_v19 = vand.u32 4294901760, %v3357_v7 }
  0x8d   : > { %8103 = vmatpush3.msra.mxu0 %v9082_v17  ;;  %8109 = vmatprep.subr.mxu1 %v1927_v46  ;;  %v9192_v57 = vsub.f32 %v2334_v49, %v9177_v52  ;;  %v9327_v49 = vsub.f32 %v3358_v41, %v9311_v45 }
  0x8e   : > { %8104 = vmatprep.subr.mxu0 %v9088_v21  ;;  %8110 = vmatpush3.msra.mxu1 %v1927_v46  ;;  %v9204_v62 = vsub.f32 %v2337_v51, %v9183_v29  ;;  %v9209_v60 = vand.u32 4294901760, %v9188_v55  ;;  %v3360_v46 = vsel %vm189_vm0, %v8898_v32, 0 }
  0x8f   : > { %8105 = vmatpush3.msra.mxu0 %v9088_v21  ;;  %8111 = vmatprep.subr.mxu1 %v1934_v48  ;;  %v2408_v63 = vand.u32 4294901760, %v9192_v57 }
  0x90   : > { %8106 = vmatprep.mubr.f32.mxu0 %v1878_v50  ;;  %8112 = vmatpush3.msra.mxu1 %v1934_v48  ;;  %v2418_v4 = vand.u32 4294901760, %v9204_v62  ;;  %v2465_v9 = vsub.f32 %v9188_v55, %v9209_v60  ;;  %v9329_v50 = vand.u32 4294901760, %v3363_v47 }
  0x91   : > { %8113 = vmatprep.mubr.f32.mxu1 %v9092_v24  ;;  %8116 = vmatprep.subr.mxu0 %v9096_v25  ;;  %v2409_v10 = vsub.f32 %v9192_v57, %v2408_v63 }
  0x92   : > { %8107 = vmatmul.mubr.f32.vlgmr.msra.gmra.mxu0 %v1888_v28  ;;  %8114 = vmatmul.mubr.f32.vlgmr.msra.gmra.mxu1 %v9098_v26  ;;  %v2419_v53 = vsub.f32 %v9204_v62, %v2418_v4  ;;  %v2466_v6 = vand.u32 4294901760, %v2465_v9  ;;  %v9343_v28 = vand.u32 4294901760, %v9327_v49 }
  0x93   : > { %8117 = vmatpush3.msra.mxu0 %v9096_v25  ;;  %8123 = vmatprep.subr.mxu1 %v9082_v17  ;;  %v2410_v56 = vand.u32 4294901760, %v2409_v10 }
  0x94   : > { %8118 = vmatprep.subr.mxu0 %v9103_v27  ;;  %8124 = vmatpush3.msra.mxu1 %v9082_v17  ;;  %v2420_v22 = vand.u32 4294901760, %v2419_v53  ;;  %v9397_v53 = vsub.f32 %v3871_v61, %v9381_v3 }
  0x95   : > { %8119 = vmatpush3.msra.mxu0 %v9103_v27  ;;  %8125 = vmatprep.subr.mxu1 %v9088_v21 }
  0x96   : > { %8120 = vmatprep.mubr.f32.mxu0 %v9107_v30  ;;  %8126 = vmatpush3.msra.mxu1 %v9088_v21 }
  0x97   : > { %8127 = vmatprep.mubr.f32.mxu1 %v1876_v39  ;;  %8130 = vmatprep.subr.mxu0 %v9112_v31 }
  0x98   : > { %8121 = vmatmul.mubr.f32.vlgmr.msra.gmra.mxu0 %v9122_v36  ;;  %8128 = vmatmul.mubr.f32.vlgmr.msra.gmra.mxu1 %v1886_v42 }
  0x99   : > { %8131 = vmatpush3.msra.mxu0 %v9112_v31  ;;  %8137 = vmatprep.subr.mxu1 %v9082_v17 }
  0x9a   : > { %8132 = vmatprep.subr.mxu0 %v9128_v37  ;;  %8138 = vmatpush3.msra.mxu1 %v9082_v17  ;;  %v9245_v17 = vand.u32 4294901760, %v2845_v11 }
  0x9b   : > { %8133 = vmatpush3.msra.mxu0 %v9128_v37  ;;  %8139 = vmatprep.subr.mxu1 %v9088_v21 }
  0x9c   : > { %8134 = vmatprep.mubr.f32.mxu0 %v9092_v24  ;;  %8140 = vmatpush3.msra.mxu1 %v9088_v21  ;;  %v9251_v21 = vand.u32 4294901760, %v2844_v14  ;;  %v9259_v25 = vsub.f32 %v2845_v11, %v9245_v17  ;;  %v3876_v11 = vsel %vm189_vm0, %v8951_v15, 0 }
  0x9d   : > { %8141 = vmatprep.mubr.f32.mxu1 %v9092_v24  ;;  %8144 = vmatprep.subr.mxu0 %v9167_v2  ;;  %v9255_v24 = vand.u32 4294901760, %v2847_v18 }
  0x9e   : > { %8135 = vmatmul.mubr.f32.vlgmr.msra.gmra.mxu0 %v9098_v26  ;;  %8142 = vmatmul.mubr.f32.vlgmr.msra.gmra.mxu1 %v9098_v26  ;;  %v9261_v26 = vand.u32 4294901760, %v2850_v23  ;;  %v9266_v27 = vsub.f32 %v2844_v14, %v9251_v21  ;;  %v9275_v31 = vand.u32 4294901760, %v9259_v25  ;;  %v9399_v14 = vand.u32 4294901760, %v3876_v11 }
  0x9f   : > { %8145 = vmatpush3.msra.mxu0 %v9167_v2  ;;  %8151 = vmatprep.subr.mxu1 %v2459_v12  ;;  %v9270_v30 = vsub.f32 %v2847_v18, %v9255_v24  ;;  %v9416_v18 = vand.u32 4294901760, %v9397_v53 }
  0xa0   : > { %8146 = vmatprep.subr.mxu0 %v9173_v20  ;;  %8152 = vmatpush3.msra.mxu1 %v2459_v12  ;;  %v9280_v33 = vsub.f32 %v2850_v23, %v9261_v26  ;;  %v9285_v34 = vand.u32 4294901760, %v9266_v27  ;;  %v2971_v36 = vsub.f32 %v9259_v25, %v9275_v31  ;;  %v4390_v23 = vrot.slane %v8898_v32, 1 }
  0xa1   : > { %8147 = vmatpush3.msra.mxu0 %v9173_v20  ;;  %8153 = vmatprep.subr.mxu1 %v2466_v6  ;;  %v2921_v35 = vand.u32 4294901760, %v9270_v30 }
  0xa2   : > { %8148 = vmatprep.mubr.f32.mxu0 %v2410_v56  ;;  %8154 = vmatpush3.msra.mxu1 %v2466_v6  ;;  %v2931_v37 = vand.u32 4294901760, %v9280_v33  ;;  %v2978_v39 = vsub.f32 %v9266_v27, %v9285_v34  ;;  %v2972_v42 = vand.u32 4294901760, %v2971_v36  ;;  %v9407_v6 = vadd.s32 8, %v8859_v1 }
  0xa3   : > { %8155 = vmatprep.mubr.f32.mxu1 %v9177_v52  ;;  %8158 = vmatprep.subr.mxu0 %v9181_v54  ;;  %v2922_v40 = vsub.f32 %v9270_v30, %v2921_v35  ;;  %v9421_v56 = vsub.f32 %v3876_v11, %v9399_v14 }
  0xa4   : > { %8149 = vmatmul.mubr.f32.vlgmr.msra.gmra.mxu0 %v2420_v22  ;;  %8156 = vmatmul.mubr.f32.vlgmr.msra.gmra.mxu1 %v9183_v29  ;;  %v2932_v43 = vsub.f32 %v9280_v33, %v2931_v37  ;;  %v2979_v44 = vand.u32 4294901760, %v2978_v39  ;;  %v4391_v22 = vrot.slane %v8907_v38, 1  ;;  %v4404_v39 = vld [vmem:[#allocation4 + $0x40] sm:$0xff] }
  0xa5   : > { %8159 = vmatpush3.msra.mxu0 %v9181_v54  ;;  %8165 = vmatprep.subr.mxu1 %v9167_v2  ;;  %v2923_v8 = vand.u32 4294901760, %v2922_v40 }
  0xa6   : > { %8160 = vmatprep.subr.mxu0 %v9188_v55  ;;  %8166 = vmatpush3.msra.mxu1 %v9167_v2  ;;  %v2933_v48 = vand.u32 4294901760, %v2932_v43 }
  0xa7   : > { %8161 = vmatpush3.msra.mxu0 %v9188_v55  ;;  %8167 = vmatprep.subr.mxu1 %v9173_v20  ;;  %v3484_v55 = vsub.f32 %v9327_v49, %v9343_v28 }
  0xa8   : > { %8162 = vmatprep.mubr.f32.mxu0 %v9192_v57  ;;  %8168 = vmatpush3.msra.mxu1 %v9173_v20 }
  0xa9   : > { %8169 = vmatprep.mubr.f32.mxu1 %v2408_v63  ;;  %8172 = vmatprep.subr.mxu0 %v9197_v58  ;;  %v3870_v63 = vld [vmem:[#allocation4 + $0xa0] sm:$0xff] }
  0xaa   : > { %8163 = vmatmul.mubr.f32.vlgmr.msra.gmra.mxu0 %v9204_v62  ;;  %8170 = vmatmul.mubr.f32.vlgmr.msra.gmra.mxu1 %v2418_v4  ;;  %v3485_v62 = vand.u32 4294901760, %v3484_v55  ;;  %v3873_v4 = vsel %vm189_vm0, %v8937_v5, 0  ;;  %v9388_v10 = vand.u32 4294901760, %v3870_v63 }
  0xab   : > { %8173 = vmatpush3.msra.mxu0 %v9197_v58  ;;  %8179 = vmatprep.subr.mxu1 %v9167_v2  ;;  %v9393_v12 = vand.u32 4294901760, %v3873_v4 }
  0xac   : > { %8174 = vmatprep.subr.mxu0 %v9209_v60  ;;  %8180 = vmatpush3.msra.mxu1 %v9167_v2  ;;  %v9323_v2 = vand.u32 4294901760, %v3360_v46  ;;  %v9404_v16 = vsub.f32 %v3870_v63, %v9388_v10  ;;  %v4917_v63 = vld [vmem:[#allocation4 + $0xb0] sm:$0xff] }
  0xad   : > { %8175 = vmatpush3.msra.mxu0 %v9209_v60  ;;  %8181 = vmatprep.subr.mxu1 %v9173_v20  ;;  %v9557_v11 = vand.u32 4294901760, %v4917_v63 }
  0xae   : > { %8176 = vmatprep.mubr.f32.mxu0 %v9177_v52  ;;  %8182 = vmatpush3.msra.mxu1 %v9173_v20  ;;  %v9334_v20 = vsub.f32 %v3357_v7, %v9318_v19  ;;  %v9338_v51 = vsub.f32 %v3360_v46, %v9323_v2 }
  0xaf   : > { %8183 = vmatprep.mubr.f32.mxu1 %v9177_v52  ;;  %8186 = vmatprep.subr.mxu0 %v9245_v17  ;;  %v9348_v52 = vsub.f32 %v3363_v47, %v9329_v50 }
  0xb0   : > { %8177 = vmatmul.mubr.f32.vlgmr.msra.gmra.mxu0 %v9183_v29  ;;  %8184 = vmatmul.mubr.f32.vlgmr.msra.gmra.mxu1 %v9183_v29  ;;  %v9353_v54 = vand.u32 4294901760, %v9334_v20  ;;  %v3434_v29 = vand.u32 4294901760, %v9338_v51 }
  0xb1   : > { %8187 = vmatpush3.msra.mxu0 %v9245_v17  ;;  %8193 = vmatprep.subr.mxu1 %v2972_v42  ;;  %v3444_v57 = vand.u32 4294901760, %v9348_v52 }
  0xb2   : > { %8188 = vmatprep.subr.mxu0 %v9251_v21  ;;  %8194 = vmatpush3.msra.mxu1 %v2972_v42  ;;  %v3491_v58 = vsub.f32 %v9334_v20, %v9353_v54  ;;  %v3435_v59 = vsub.f32 %v9338_v51, %v3434_v29 }
  0xb3   : > { %8189 = vmatpush3.msra.mxu0 %v9251_v21  ;;  %8195 = vmatprep.subr.mxu1 %v2979_v44  ;;  %v3445_v60 = vsub.f32 %v9348_v52, %v3444_v57 }
  0xb4   : > { %8190 = vmatprep.mubr.f32.mxu0 %v2923_v8  ;;  %8196 = vmatpush3.msra.mxu1 %v2979_v44  ;;  %v3492_v0 = vand.u32 4294901760, %v3491_v58  ;;  %v3436_v9 = vand.u32 4294901760, %v3435_v59  ;;  %v9477_v44 = vand.u32 4294901760, %v4404_v39  ;;  %v4918_v59 = vld [vmem:[#allocation4 + $0xb8] sm:$0xff] }
  0xb5   : > { %8197 = vmatprep.mubr.f32.mxu1 %v9255_v24  ;;  %8200 = vmatprep.subr.mxu0 %v9259_v25  ;;  %v3446_v13 = vand.u32 4294901760, %v3445_v60 }
  0xb6   : > { %8191 = vmatmul.mubr.f32.vlgmr.msra.gmra.mxu0 %v2933_v48  ;;  %8198 = vmatmul.mubr.f32.vlgmr.msra.gmra.mxu1 %v9261_v26  ;;  %v9492_v48 = vsub.f32 %v4404_v39, %v9477_v44 }
  0xb7   : > { %8201 = vmatpush3.msra.mxu0 %v9259_v25  ;;  %8207 = vmatprep.subr.mxu1 %v9245_v17 }
  0xb8   : > { %8202 = vmatprep.subr.mxu0 %v9266_v27  ;;  %8208 = vmatpush3.msra.mxu1 %v9245_v17 }
  0xb9   : > { %8203 = vmatpush3.msra.mxu0 %v9266_v27  ;;  %8209 = vmatprep.subr.mxu1 %v9251_v21  ;;  %v3957_v27 = vand.u32 4294901760, %v9421_v56 }
  0xba   : > { %8204 = vmatprep.mubr.f32.mxu0 %v9270_v30  ;;  %8210 = vmatpush3.msra.mxu1 %v9251_v21 }
  0xbb   : > { %8211 = vmatprep.mubr.f32.mxu1 %v2921_v35  ;;  %8214 = vmatprep.subr.mxu0 %v9275_v31  ;;  %v4393_v35 = vsel %vm4392_vm7, %v4390_v23, %v4391_v22 }
  0xbc   : > { %8205 = vmatmul.mubr.f32.vlgmr.msra.gmra.mxu0 %v9280_v33  ;;  %8212 = vmatmul.mubr.f32.vlgmr.msra.gmra.mxu1 %v2931_v37  ;;  %v3958_v37 = vsub.f32 %v9421_v56, %v3957_v27  ;;  %v4407_v43 = vsel %vm189_vm0, %v4393_v35, 0  ;;  %v5452_v35 = vld [vmem:[#allocation4 + $0x58] sm:$0xff] }
  0xbd   : > { %8215 = vmatpush3.msra.mxu0 %v9275_v31  ;;  %8221 = vmatprep.subr.mxu1 %v9245_v17  ;;  %v4394_v31 = vsel %vm4392_vm7, %v4391_v22, %v4390_v23  ;;  %v9481_v8 = vand.u32 4294901760, %v4407_v43  ;;  %v5437_v22 = vrot.slane %v8898_v32, 2 }
  0xbe   : > { %8216 = vmatprep.subr.mxu0 %v9285_v34  ;;  %8222 = vmatpush3.msra.mxu1 %v9245_v17  ;;  %v9411_v17 = vsub.f32 %v3873_v4, %v9393_v12  ;;  %v3959_v46 = vand.u32 4294901760, %v3958_v37  ;;  %v9551_v4 = vand.u32 4294901760, %v4918_v59 }
  0xbf   : > { %8217 = vmatpush3.msra.mxu0 %v9285_v34  ;;  %8223 = vmatprep.subr.mxu1 %v9251_v21  ;;  %v4405_v34 = vld [vmem:[#allocation4 + $0x48] sm:$0xff] }
  0xc0   : > { %8218 = vmatprep.mubr.f32.mxu0 %v9255_v24  ;;  %8224 = vmatpush3.msra.mxu1 %v9251_v21  ;;  %v9426_v21 = vand.u32 4294901760, %v9404_v16  ;;  %v3947_v25 = vand.u32 4294901760, %v9411_v17  ;;  %v9471_v42 = vand.u32 4294901760, %v4405_v34 }
  0xc1   : > { %8225 = vmatprep.mubr.f32.mxu1 %v9255_v24  ;;  %8228 = vmatprep.subr.mxu0 %v9311_v45  ;;  %v9431_v24 = vadd.s32 1, %v9407_v6 }
  0xc2   : > { %8219 = vmatmul.mubr.f32.vlgmr.msra.gmra.mxu0 %v9261_v26  ;;  %8226 = vmatmul.mubr.f32.vlgmr.msra.gmra.mxu1 %v9261_v26  ;;  %v3997_v26 = vsub.f32 %v9397_v53, %v9416_v18  ;;  %v4004_v30 = vsub.f32 %v9404_v16, %v9426_v21  ;;  %v3948_v33 = vsub.f32 %v9411_v17, %v3947_v25 }
  0xc3   : > { %8229 = vmatpush3.msra.mxu0 %v9311_v45  ;;  %8235 = vmatprep.subr.mxu1 %v3485_v62  ;;  %vm4387_vm8 = vcmp.lt.s32.totalorder %v9431_v24, 16  ;;  %v5438_v24 = vrot.slane %v8907_v38, 2 }
  0xc4   : > { %8230 = vmatprep.subr.mxu0 %v9318_v19  ;;  %8236 = vmatpush3.msra.mxu1 %v3485_v62  ;;  %v3998_v36 = vand.u32 4294901760, %v3997_v26  ;;  %v4396_v40 = vsel %vm4387_vm8, %v4394_v31, 0.0  ;;  %v4005_v41 = vand.u32 4294901760, %v4004_v30  ;;  %v3949_v7 = vand.u32 4294901760, %v3948_v33 }
  0xc5   : > { %8231 = vmatpush3.msra.mxu0 %v9318_v19  ;;  %8237 = vmatprep.subr.mxu1 %v3492_v0  ;;  %v5441_v33 = vsel %vm5439_vm9, %v5438_v24, %v5437_v22 }
  0xc6   : > { %8232 = vmatprep.mubr.f32.mxu0 %v3436_v9  ;;  %8238 = vmatpush3.msra.mxu1 %v3492_v0 }
  0xc7   : > { %8239 = vmatprep.mubr.f32.mxu1 %v9323_v2  ;;  %8242 = vmatprep.subr.mxu0 %v9327_v49 }
  0xc8   : > { %8233 = vmatmul.mubr.f32.vlgmr.msra.gmra.mxu0 %v3446_v13  ;;  %8240 = vmatmul.mubr.f32.vlgmr.msra.gmra.mxu1 %v9329_v50 }
  0xc9   : > { %8243 = vmatpush3.msra.mxu0 %v9327_v49  ;;  %8249 = vmatprep.subr.mxu1 %v9311_v45 }
  0xca   : > { %8244 = vmatprep.subr.mxu0 %v9334_v20  ;;  %8250 = vmatpush3.msra.mxu1 %v9311_v45 }
  0xcb   : > { %8245 = vmatpush3.msra.mxu0 %v9334_v20  ;;  %8251 = vmatprep.subr.mxu1 %v9318_v19  ;;  %v9511_v20 = vand.u32 4294901760, %v9492_v48 }
  0xcc   : > { %8246 = vmatprep.mubr.f32.mxu0 %v9338_v51  ;;  %8252 = vmatpush3.msra.mxu1 %v9318_v19  ;;  %v4397_v51 = vrot.slane %v8937_v5, 1 }
  0xcd   : > { %8253 = vmatprep.mubr.f32.mxu1 %v3434_v29  ;;  %8256 = vmatprep.subr.mxu0 %v9343_v28  ;;  %v4538_v55 = vsub.f32 %v9492_v48, %v9511_v20 }
  0xce   : > { %8247 = vmatmul.mubr.f32.vlgmr.msra.gmra.mxu0 %v9348_v52  ;;  %8254 = vmatmul.mubr.f32.vlgmr.msra.gmra.mxu1 %v3444_v57 }
  0xcf   : > { %8257 = vmatpush3.msra.mxu0 %v9343_v28  ;;  %8263 = vmatprep.subr.mxu1 %v9311_v45  ;;  %v4398_v28 = vrot.slane %v8951_v15, 1 }
  0xd0   : > { %8258 = vmatprep.subr.mxu0 %v9353_v54  ;;  %8264 = vmatpush3.msra.mxu1 %v9311_v45  ;;  %v4410_v45 = vsel %vm189_vm0, %v4396_v40, 0  ;;  %v5451_v40 = vld [vmem:[#allocation4 + $0x50] sm:$0xff] }
  0xd1   : > { %8259 = vmatpush3.msra.mxu0 %v9353_v54  ;;  %8265 = vmatprep.subr.mxu1 %v9318_v19  ;;  %v9487_v47 = vand.u32 4294901760, %v4410_v45  ;;  %v4400_v57 = vsel %vm4392_vm7, %v4398_v28, %v4397_v51  ;;  %v4399_v61 = vsel %vm4392_vm7, %v4397_v51, %v4398_v28  ;;  %v5444_v28 = vrot.slane %v8937_v5, 2 }
  0xd2   : > { %8260 = vmatprep.mubr.f32.mxu0 %v9323_v2  ;;  %8266 = vmatpush3.msra.mxu1 %v9318_v19  ;;  %v9485_v19 = vsub.f32 %v4405_v34, %v9471_v42  ;;  %v4402_v0 = vsel %vm4387_vm8, %v4400_v57, 0.0  ;;  %v4920_v9 = vsel %vm189_vm0, %v4399_v61, 0  ;;  %v5965_v61 = vld [vmem:[#allocation4 + $0xc8] sm:$0xff] }
  0xd3   : > { %8267 = vmatprep.mubr.f32.mxu1 %v9323_v2  ;;  %8270 = vmatprep.subr.mxu0 %v9381_v3  ;;  %v9496_v2 = vsub.f32 %v4407_v43, %v9481_v8  ;;  %v4923_v13 = vsel %vm189_vm0, %v4402_v0, 0  ;;  %v9636_v43 = vand.u32 4294901760, %v5452_v35  ;;  %v5964_v0 = vld [vmem:[#allocation4 + $0xc0] sm:$0xff] }
  0xd4   : > { %8261 = vmatmul.mubr.f32.vlgmr.msra.gmra.mxu0 %v9329_v50  ;;  %8268 = vmatmul.mubr.f32.vlgmr.msra.gmra.mxu1 %v9329_v50  ;;  %v9501_v49 = vand.u32 4294901760, %v9485_v19  ;;  %v9506_v50 = vsub.f32 %v4410_v45, %v9487_v47  ;;  %v9642_v45 = vand.u32 4294901760, %v5451_v40 }
  0xd5   : > { %8271 = vmatpush3.msra.mxu0 %v9381_v3  ;;  %8277 = vmatprep.subr.mxu1 %v3998_v36  ;;  %v4481_v52 = vand.u32 4294901760, %v9496_v2 }
  0xd6   : > { %8272 = vmatprep.subr.mxu0 %v9388_v10  ;;  %8278 = vmatpush3.msra.mxu1 %v3998_v36  ;;  %v4531_v54 = vsub.f32 %v9485_v19, %v9501_v49  ;;  %v4491_v29 = vand.u32 4294901760, %v9506_v50  ;;  %v5440_v36 = vsel %vm5439_vm9, %v5437_v22, %v5438_v24  ;;  %v6484_v24 = vrot.slane %v8898_v32, 3 }
  0xd7   : > { %8273 = vmatpush3.msra.mxu0 %v9388_v10  ;;  %8279 = vmatprep.subr.mxu1 %v4005_v41  ;;  %v4482_v58 = vsub.f32 %v9496_v2, %v4481_v52 }
  0xd8   : > { %8274 = vmatprep.mubr.f32.mxu0 %v3949_v7  ;;  %8280 = vmatpush3.msra.mxu1 %v4005_v41  ;;  %v4532_v62 = vand.u32 4294901760, %v4531_v54  ;;  %v4492_v60 = vsub.f32 %v9506_v50, %v4491_v29  ;;  %v5454_v7 = vsel %vm189_vm0, %v5440_v36, 0  ;;  %v6498_v36 = vld [vmem:[#allocation4 + $0x60] sm:$0xff] }
  0xd9   : > { %8281 = vmatprep.mubr.f32.mxu1 %v9393_v12  ;;  %8284 = vmatprep.subr.mxu0 %v9397_v53 }
  0xda   : > { %8275 = vmatmul.mubr.f32.vlgmr.msra.gmra.mxu0 %v3959_v46  ;;  %8282 = vmatmul.mubr.f32.vlgmr.msra.gmra.mxu1 %v9399_v14 }
  0xdb   : > { %8285 = vmatpush3.msra.mxu0 %v9397_v53  ;;  %8291 = vmatprep.subr.mxu1 %v9381_v3  ;;  %v9561_v53 = vand.u32 4294901760, %v4920_v9 }
  0xdc   : > { %8286 = vmatprep.subr.mxu0 %v9404_v16  ;;  %8292 = vmatpush3.msra.mxu1 %v9381_v3 }
  0xdd   : > { %8287 = vmatpush3.msra.mxu0 %v9404_v16  ;;  %8293 = vmatprep.subr.mxu1 %v9388_v10  ;;  %v9565_v16 = vsub.f32 %v4918_v59, %v9551_v4 }
  0xde   : > { %8288 = vmatprep.mubr.f32.mxu0 %v9411_v17  ;;  %8294 = vmatpush3.msra.mxu1 %v9388_v10  ;;  %v9572_v17 = vsub.f32 %v4917_v63, %v9557_v11 }
  0xdf   : > { %8295 = vmatprep.mubr.f32.mxu1 %v3947_v25  ;;  %8298 = vmatprep.subr.mxu0 %v9416_v18  ;;  %v9596_v25 = vadd.s32 2, %v9407_v6 }
  0xe0   : > { %8289 = vmatmul.mubr.f32.vlgmr.msra.gmra.mxu0 %v9421_v56  ;;  %8296 = vmatmul.mubr.f32.vlgmr.msra.gmra.mxu1 %v3957_v27  ;;  %v9581_v56 = vand.u32 4294901760, %v9565_v16  ;;  %v9591_v23 = vand.u32 4294901760, %v9572_v17 }
  0xe1   : > { %8299 = vmatpush3.msra.mxu0 %v9416_v18  ;;  %8305 = vmatprep.subr.mxu1 %v9381_v3  ;;  %v9576_v18 = vsub.f32 %v4920_v9, %v9561_v53  ;;  %vm5434_vm10 = vcmp.lt.s32.totalorder %v9596_v25, 16  ;;  %v9716_v9 = vand.u32 4294901760, %v5965_v61  ;;  %v6485_v25 = vrot.slane %v8907_v38, 3 }
  0xe2   : > { %8300 = vmatprep.subr.mxu0 %v9426_v21  ;;  %8306 = vmatpush3.msra.mxu1 %v9381_v3  ;;  %v4539_v3 = vand.u32 4294901760, %v4538_v55  ;;  %v5044_v27 = vsub.f32 %v9565_v16, %v9581_v56  ;;  %v5051_v31 = vsub.f32 %v9572_v17, %v9591_v23  ;;  %v5443_v41 = vsel %vm5434_vm10, %v5441_v33, 0.0  ;;  %v6499_v33 = vld [vmem:[#allocation4 + $0x68] sm:$0xff] }
  0xe3   : > { %8301 = vmatpush3.msra.mxu0 %v9426_v21  ;;  %8307 = vmatprep.subr.mxu1 %v9388_v10  ;;  %v4994_v26 = vand.u32 4294901760, %v9576_v18  ;;  %v5457_v46 = vsel %vm189_vm0, %v5443_v41, 0 }
  0xe4   : > { %8302 = vmatprep.mubr.f32.mxu0 %v9393_v12  ;;  %8308 = vmatpush3.msra.mxu1 %v9388_v10  ;;  %v4483_v10 = vand.u32 4294901760, %v4482_v58  ;;  %v5045_v37 = vand.u32 4294901760, %v5044_v27 }
  0xe5   : > { %8309 = vmatprep.mubr.f32.mxu1 %v9393_v12  ;;  %8312 = vmatprep.subr.mxu0 %v9471_v42  ;;  %v4493_v12 = vand.u32 4294901760, %v4492_v60  ;;  %v4995_v34 = vsub.f32 %v9576_v18, %v4994_v26 }
  0xe6   : > { %8303 = vmatmul.mubr.f32.vlgmr.msra.gmra.mxu0 %v9399_v14  ;;  %8310 = vmatmul.mubr.f32.vlgmr.msra.gmra.mxu1 %v9399_v14  ;;  %v9567_v14 = vand.u32 4294901760, %v4923_v13 }
  0xe7   : > { %8313 = vmatpush3.msra.mxu0 %v9471_v42  ;;  %8319 = vmatprep.subr.mxu1 %v4532_v62 }
  0xe8   : > { %8314 = vmatprep.subr.mxu0 %v9477_v44  ;;  %8320 = vmatpush3.msra.mxu1 %v4532_v62  ;;  %v9586_v21 = vsub.f32 %v4923_v13, %v9567_v14  ;;  %v9722_v13 = vand.u32 4294901760, %v5964_v0 }
  0xe9   : > { %8315 = vmatpush3.msra.mxu0 %v9477_v44  ;;  %8321 = vmatprep.subr.mxu1 %v4539_v3 }
  0xea   : > { %8316 = vmatprep.mubr.f32.mxu0 %v4483_v10  ;;  %8322 = vmatpush3.msra.mxu1 %v4539_v3  ;;  %v5004_v30 = vand.u32 4294901760, %v9586_v21 }
  0xeb   : > { %8323 = vmatprep.mubr.f32.mxu1 %v9481_v8  ;;  %8326 = vmatprep.subr.mxu0 %v9485_v19 }
  0xec   : > { %8317 = vmatmul.mubr.f32.vlgmr.msra.gmra.mxu0 %v4493_v12  ;;  %8324 = vmatmul.mubr.f32.vlgmr.msra.gmra.mxu1 %v9487_v47  ;;  %v5005_v39 = vsub.f32 %v9586_v21, %v5004_v30 }
  0xed   : > { %8327 = vmatpush3.msra.mxu0 %v9485_v19  ;;  %8333 = vmatprep.subr.mxu1 %v9471_v42  ;;  %v9646_v19 = vand.u32 4294901760, %v5454_v7 }
  0xee   : > { %8328 = vmatprep.subr.mxu0 %v9492_v48  ;;  %8334 = vmatpush3.msra.mxu1 %v9471_v42 }
  0xef   : > { %8329 = vmatpush3.msra.mxu0 %v9492_v48  ;;  %8335 = vmatprep.subr.mxu1 %v9477_v44  ;;  %v9650_v48 = vsub.f32 %v5452_v35, %v9636_v43 }
  0xf0   : > { %8330 = vmatprep.mubr.f32.mxu0 %v9496_v2  ;;  %8336 = vmatpush3.msra.mxu1 %v9477_v44  ;;  %v9657_v2 = vsub.f32 %v5451_v40, %v9642_v45 }
  0xf1   : > { %8337 = vmatprep.mubr.f32.mxu1 %v4481_v52  ;;  %8340 = vmatprep.subr.mxu0 %v9501_v49  ;;  %v5445_v52 = vrot.slane %v8951_v15, 2 }
  0xf2   : > { %8331 = vmatmul.mubr.f32.vlgmr.msra.gmra.mxu0 %v9506_v50  ;;  %8338 = vmatmul.mubr.f32.vlgmr.msra.gmra.mxu1 %v4491_v29  ;;  %v9666_v50 = vand.u32 4294901760, %v9650_v48  ;;  %v9676_v51 = vand.u32 4294901760, %v9657_v2 }
  0xf3   : > { %8341 = vmatpush3.msra.mxu0 %v9501_v49  ;;  %8347 = vmatprep.subr.mxu1 %v9471_v42  ;;  %v9661_v49 = vsub.f32 %v5454_v7, %v9646_v19  ;;  %v5447_v58 = vsel %vm5439_vm9, %v5445_v52, %v5444_v28  ;;  %v5446_v62 = vsel %vm5439_vm9, %v5444_v28, %v5445_v52 }
  0xf4   : > { %8342 = vmatprep.subr.mxu0 %v9511_v20  ;;  %8348 = vmatpush3.msra.mxu1 %v9471_v42  ;;  %v5052_v42 = vand.u32 4294901760, %v5051_v31  ;;  %v5578_v29 = vsub.f32 %v9650_v48, %v9666_v50  ;;  %v5585_v57 = vsub.f32 %v9657_v2, %v9676_v51  ;;  %v5449_v3 = vsel %vm5434_vm10, %v5447_v58, 0.0 }
  0xf5   : > { %8343 = vmatpush3.msra.mxu0 %v9511_v20  ;;  %8349 = vmatprep.subr.mxu1 %v9477_v44  ;;  %v5528_v54 = vand.u32 4294901760, %v9661_v49  ;;  %v5967_v10 = vsel %vm189_vm0, %v5446_v62, 0  ;;  %v5970_v12 = vsel %vm189_vm0, %v5449_v3, 0  ;;  %v6492_v58 = vrot.slane %v8951_v15, 3 }
  0xf6   : > { %8344 = vmatprep.mubr.f32.mxu0 %v9481_v8  ;;  %8350 = vmatpush3.msra.mxu1 %v9477_v44  ;;  %v4996_v44 = vand.u32 4294901760, %v4995_v34  ;;  %v5579_v60 = vand.u32 4294901760, %v5578_v29  ;;  %v6487_v34 = vsel %vm6486_vm11, %v6484_v24, %v6485_v25 }
  0xf7   : > { %8351 = vmatprep.mubr.f32.mxu1 %v9481_v8  ;;  %8354 = vmatprep.subr.mxu0 %v9551_v4  ;;  %v5006_v8 = vand.u32 4294901760, %v5005_v39  ;;  %v5529_v59 = vsub.f32 %v9661_v49, %v5528_v54 }
  0xf8   : > { %8345 = vmatmul.mubr.f32.vlgmr.msra.gmra.mxu0 %v9487_v47  ;;  %8352 = vmatmul.mubr.f32.vlgmr.msra.gmra.mxu1 %v9487_v47  ;;  %v9652_v47 = vand.u32 4294901760, %v5457_v46 }
  0xf9   : > { %8355 = vmatpush3.msra.mxu0 %v9551_v4  ;;  %8361 = vmatprep.subr.mxu1 %v5045_v37 }
  0xfa   : > { %8356 = vmatprep.subr.mxu0 %v9557_v11  ;;  %8362 = vmatpush3.msra.mxu1 %v5045_v37  ;;  %v9671_v20 = vsub.f32 %v5457_v46, %v9652_v47 }
  0xfb   : > { %8357 = vmatpush3.msra.mxu0 %v9557_v11  ;;  %8363 = vmatprep.subr.mxu1 %v5052_v42 }
  0xfc   : > { %8358 = vmatprep.mubr.f32.mxu0 %v4996_v44  ;;  %8364 = vmatpush3.msra.mxu1 %v5052_v42  ;;  %v5538_v55 = vand.u32 4294901760, %v9671_v20  ;;  %v9801_v42 = vand.u32 4294901760, %v6499_v33  ;;  %v9806_v44 = vand.u32 4294901760, %v6498_v36 }
  0xfd   : > { %8365 = vmatprep.mubr.f32.mxu1 %v9561_v53  ;;  %8368 = vmatprep.subr.mxu0 %v9565_v16 }
  0xfe   : > { %8359 = vmatmul.mubr.f32.vlgmr.msra.gmra.mxu0 %v5006_v8  ;;  %8366 = vmatmul.mubr.f32.vlgmr.msra.gmra.mxu1 %v9567_v14  ;;  %v5539_v63 = vsub.f32 %v9671_v20, %v5538_v55 }
  0xff   : > { %8369 = vmatpush3.msra.mxu0 %v9565_v16  ;;  %8375 = vmatprep.subr.mxu1 %v9551_v4  ;;  %v9726_v16 = vand.u32 4294901760, %v5967_v10 }
 0x100   : > { %8370 = vmatprep.subr.mxu0 %v9572_v17  ;;  %8376 = vmatpush3.msra.mxu1 %v9551_v4 }
 0x101   : > { %8371 = vmatpush3.msra.mxu0 %v9572_v17  ;;  %8377 = vmatprep.subr.mxu1 %v9557_v11  ;;  %v9730_v17 = vsub.f32 %v5965_v61, %v9716_v9 }
 0x102   : > { %8372 = vmatprep.mubr.f32.mxu0 %v9576_v18  ;;  %8378 = vmatpush3.msra.mxu1 %v9557_v11  ;;  %v9737_v18 = vsub.f32 %v5964_v0, %v9722_v13 }
 0x103   : > { %8379 = vmatprep.mubr.f32.mxu1 %v4994_v26  ;;  %8382 = vmatprep.subr.mxu0 %v9581_v56  ;;  %v9761_v26 = vadd.s32 3, %v9407_v6 }
 0x104   : > { %8373 = vmatmul.mubr.f32.vlgmr.msra.gmra.mxu0 %v9586_v21  ;;  %8380 = vmatmul.mubr.f32.vlgmr.msra.gmra.mxu1 %v5004_v30  ;;  %v9746_v21 = vand.u32 4294901760, %v9730_v17  ;;  %v9756_v22 = vand.u32 4294901760, %v9737_v18  ;;  %v6488_v30 = vsel %vm6486_vm11, %v6485_v25, %v6484_v24 }
 0x105   : > { %8383 = vmatpush3.msra.mxu0 %v9581_v56  ;;  %8389 = vmatprep.subr.mxu1 %v9551_v4  ;;  %v9741_v56 = vsub.f32 %v5967_v10, %v9726_v16  ;;  %vm6481_vm12 = vcmp.lt.s32.totalorder %v9761_v26, 16 }
 0x106   : > { %8384 = vmatprep.subr.mxu0 %v9591_v23  ;;  %8390 = vmatpush3.msra.mxu1 %v9551_v4  ;;  %v5586_v4 = vand.u32 4294901760, %v5585_v57  ;;  %v6091_v32 = vsub.f32 %v9730_v17, %v9746_v21  ;;  %v6098_v6 = vsub.f32 %v9737_v18, %v9756_v22  ;;  %v6490_v39 = vsel %vm6481_vm12, %v6488_v30, 0.0 }
 0x107   : > { %8385 = vmatpush3.msra.mxu0 %v9591_v23  ;;  %8391 = vmatprep.subr.mxu1 %v9557_v11  ;;  %v6041_v27 = vand.u32 4294901760, %v9741_v56  ;;  %v6504_v46 = vsel %vm189_vm0, %v6490_v39, 0  ;;  %v6491_v57 = vrot.slane %v8937_v5, 3 }
 0x108   : > { %8386 = vmatprep.mubr.f32.mxu0 %v9561_v53  ;;  %8392 = vmatpush3.msra.mxu1 %v9557_v11  ;;  %v5530_v11 = vand.u32 4294901760, %v5529_v59  ;;  %v6092_v35 = vand.u32 4294901760, %v6091_v32  ;;  %v6099_v41 = vand.u32 4294901760, %v6098_v6 }
 0x109   : > { %8393 = vmatprep.mubr.f32.mxu1 %v9561_v53  ;;  %8396 = vmatprep.subr.mxu0 %v9636_v43  ;;  %v5540_v53 = vand.u32 4294901760, %v5539_v63  ;;  %v6042_v31 = vsub.f32 %v9741_v56, %v6041_v27 }
 0x10a   : > { %8387 = vmatmul.mubr.f32.vlgmr.msra.gmra.mxu0 %v9567_v14  ;;  %8394 = vmatmul.mubr.f32.vlgmr.msra.gmra.mxu1 %v9567_v14  ;;  %v9732_v14 = vand.u32 4294901760, %v5970_v12 }
 0x10b   : > { %8397 = vmatpush3.msra.mxu0 %v9636_v43  ;;  %8403 = vmatprep.subr.mxu1 %v5579_v60  ;;  %v6043_v7 = vand.u32 4294901760, %v6042_v31 }
 0x10c   : > { %8398 = vmatprep.subr.mxu0 %v9642_v45  ;;  %8404 = vmatpush3.msra.mxu1 %v5579_v60  ;;  %v9751_v23 = vsub.f32 %v5970_v12, %v9732_v14 }
 0x10d   : > { %8399 = vmatpush3.msra.mxu0 %v9642_v45  ;;  %8405 = vmatprep.subr.mxu1 %v5586_v4 }
 0x10e   : > { %8400 = vmatprep.mubr.f32.mxu0 %v5530_v11  ;;  %8406 = vmatpush3.msra.mxu1 %v5586_v4  ;;  %v6051_v38 = vand.u32 4294901760, %v9751_v23  ;;  %v6494_v4 = vsel %vm6486_vm11, %v6492_v58, %v6491_v57 }
 0x10f   : > { %8407 = vmatprep.mubr.f32.mxu1 %v9646_v19  ;;  %8410 = vmatprep.subr.mxu0 %v9650_v48  ;;  %v6496_v1 = vsel %vm6481_vm12, %v6494_v4, 0.0 }
 0x110   : > { %8401 = vmatmul.mubr.f32.vlgmr.msra.gmra.mxu0 %v5540_v53  ;;  %8408 = vmatmul.mubr.f32.vlgmr.msra.gmra.mxu1 %v9652_v47  ;;  %v6052_v37 = vsub.f32 %v9751_v23, %v6051_v38 }
 0x111   : > { %8411 = vmatpush3.msra.mxu0 %v9650_v48  ;;  %8417 = vmatprep.subr.mxu1 %v9636_v43 }
 0x112   : > { %8412 = vmatprep.subr.mxu0 %v9657_v2  ;;  %8418 = vmatpush3.msra.mxu1 %v9636_v43  ;;  %v6053_v8 = vand.u32 4294901760, %v6052_v37 }
 0x113   : > { %8413 = vmatpush3.msra.mxu0 %v9657_v2  ;;  %8419 = vmatprep.subr.mxu1 %v9642_v45  ;;  %v9818_v2 = vsub.f32 %v6498_v36, %v9806_v44 }
 0x114   : > { %8414 = vmatprep.mubr.f32.mxu0 %v9661_v49  ;;  %8420 = vmatpush3.msra.mxu1 %v9642_v45  ;;  %v9820_v49 = vand.u32 4294901760, %v6504_v46 }
 0x115   : > { %8421 = vmatprep.mubr.f32.mxu1 %v5528_v54  ;;  %8424 = vmatprep.subr.mxu0 %v9666_v50  ;;  %v9836_v54 = vand.u32 4294901760, %v9818_v2 }
 0x116   : > { %8415 = vmatmul.mubr.f32.vlgmr.msra.gmra.mxu0 %v9671_v20  ;;  %8422 = vmatmul.mubr.f32.vlgmr.msra.gmra.mxu1 %v5538_v55  ;;  %v9839_v29 = vsub.f32 %v6504_v46, %v9820_v49 }
 0x117   : > { %8425 = vmatpush3.msra.mxu0 %v9666_v50  ;;  %8431 = vmatprep.subr.mxu1 %v9636_v43  ;;  %v6632_v15 = vsub.f32 %v9818_v2, %v9836_v54 }
 0x118   : > { %8426 = vmatprep.subr.mxu0 %v9676_v51  ;;  %8432 = vmatpush3.msra.mxu1 %v9636_v43  ;;  %v6501_v43 = vsel %vm189_vm0, %v6487_v34, 0  ;;  %v6585_v0 = vand.u32 4294901760, %v9839_v29 }
 0x119   : > { %8427 = vmatpush3.msra.mxu0 %v9676_v51  ;;  %8433 = vmatprep.subr.mxu1 %v9642_v45 }
 0x11a   : > { %8428 = vmatprep.mubr.f32.mxu0 %v9646_v19  ;;  %8434 = vmatpush3.msra.mxu1 %v9642_v45  ;;  %v7989_v40 = vpop.f32.mrf.mxu1  ;;  %v6586_v25 = vsub.f32 %v9839_v29, %v6585_v0 }
 0x11b   : > { %8435 = vmatprep.mubr.f32.mxu1 %v9646_v19  ;;  %8438 = vmatprep.subr.mxu0 %v9716_v9  ;;  %v9811_v19 = vand.u32 4294901760, %v6501_v43 }
 0x11c   : > { %8429 = vmatmul.mubr.f32.vlgmr.msra.gmra.mxu0 %v9652_v47  ;;  %8436 = vmatmul.mubr.f32.vlgmr.msra.gmra.mxu1 %v9652_v47  ;;  %v444_v45 = vpop.f32.mrf.mxu1  ;;  %v9815_v47 = vsub.f32 %v6499_v33, %v9801_v42  ;;  %v6587_v36 = vand.u32 4294901760, %v6586_v25 }
 0x11d   : > { %8439 = vmatpush3.msra.mxu0 %v9716_v9  ;;  %8445 = vmatprep.subr.mxu1 %v6092_v35  ;;  %v9826_v20 = vsub.f32 %v6501_v43, %v9811_v19 }
 0x11e   : > { %8440 = vmatprep.subr.mxu0 %v9722_v13  ;;  %8446 = vmatpush3.msra.mxu1 %v6092_v35  ;;  %v8003_v48 = vpop.f32.mrf.mxu1  ;;  %v9831_v28 = vand.u32 4294901760, %v9815_v47 }
 0x11f   : > { %8441 = vmatpush3.msra.mxu0 %v9722_v13  ;;  %8447 = vmatprep.subr.mxu1 %v6099_v41  ;;  %v6575_v62 = vand.u32 4294901760, %v9826_v20 }
 0x120   : > { %8442 = vmatprep.mubr.f32.mxu0 %v6043_v7  ;;  %8448 = vmatpush3.msra.mxu1 %v6099_v41  ;;  %v608_v50 = vpop.f32.mrf.mxu1  ;;  %v6625_v63 = vsub.f32 %v9815_v47, %v9831_v28 }
 0x121   : > { %8449 = vmatprep.mubr.f32.mxu1 %v9726_v16  ;;  %8452 = vmatprep.subr.mxu0 %v9730_v17  ;;  %v6576_v53 = vsub.f32 %v9826_v20, %v6575_v62 }
 0x122   : > { %8443 = vmatmul.mubr.f32.vlgmr.msra.gmra.mxu0 %v6053_v8  ;;  %8450 = vmatmul.mubr.f32.vlgmr.msra.gmra.mxu1 %v9732_v14  ;;  %v7982_v51 = vpop.f32.mrf.mxu0  ;;  %v8017_v61 = vpop.f32.mrf.mxu1 }
 0x123   : > { %8453 = vmatpush3.msra.mxu0 %v9730_v17  ;;  %8459 = vmatprep.subr.mxu1 %v9716_v9  ;;  %v451_v52 = vadd.f32 %v7989_v40, %v7982_v51  ;;  %v7012_v17 = vld [vmem:[#allocation4 + $0xd8] sm:$0xff]  ;;  %v6577_v31 = vand.u32 4294901760, %v6576_v53 }
 0x124   : > { %8454 = vmatprep.subr.mxu0 %v9737_v18  ;;  %8460 = vmatpush3.msra.mxu1 %v9716_v9  ;;  %v353_v55 = vpop.f32.mrf.mxu0  ;;  %v772_v12 = vpop.f32.mrf.mxu1 }
 0x125   : > { %8455 = vmatpush3.msra.mxu0 %v9737_v18  ;;  %8461 = vmatprep.subr.mxu1 %v9722_v13  ;;  %v445_v59 = vadd.f32 %v444_v45, %v353_v55  ;;  %v6493_v18 = vsel %vm6486_vm11, %v6491_v57, %v6492_v58 }
 0x126   : > { %8456 = vmatprep.mubr.f32.mxu0 %v9741_v56  ;;  %8462 = vmatpush3.msra.mxu1 %v9722_v13  ;;  %v7996_v60 = vpop.f32.mrf.mxu0 }
 0x127   : > { %8463 = vmatprep.mubr.f32.mxu1 %v6041_v27  ;;  %8466 = vmatprep.subr.mxu0 %v9746_v21  ;;  %v534_v5 = vadd.f32 %v7996_v60, %v451_v52  ;;  %v7011_v27 = vld [vmem:[#allocation4 + $0xd0] sm:$0xff] }
 0x128   : > { %8457 = vmatmul.mubr.f32.vlgmr.msra.gmra.mxu0 %v9751_v23  ;;  %8464 = vmatmul.mubr.f32.vlgmr.msra.gmra.mxu1 %v6051_v38  ;;  %v526_v3 = vpop.f32.mrf.mxu0  ;;  %v7014_v38 = vsel %vm189_vm0, %v6493_v18, 0  ;;  %v9887_v26 = vand.u32 4294901760, %v7011_v27 }
 0x129   : > { %8467 = vmatpush3.msra.mxu0 %v9746_v21  ;;  %8473 = vmatprep.subr.mxu1 %v9716_v9  ;;  %v617_v10 = vadd.f32 %v8003_v48, %v534_v5  ;;  %v527_v11 = vadd.f32 %v526_v3, %v445_v59  ;;  %v6626_v21 = vand.u32 4294901760, %v6625_v63  ;;  %v9891_v37 = vand.u32 4294901760, %v7014_v38 }
 0x12a   : > { %8468 = vmatprep.subr.mxu0 %v9756_v22  ;;  %8474 = vmatpush3.msra.mxu1 %v9716_v9  ;;  %v8010_v56 = vpop.f32.mrf.mxu0  ;;  %v6633_v9 = vand.u32 4294901760, %v6632_v15  ;;  %v9902_v45 = vsub.f32 %v7011_v27, %v9887_v26 }
 0x12b   : > { %8469 = vmatpush3.msra.mxu0 %v9756_v22  ;;  %8475 = vmatprep.subr.mxu1 %v9722_v13  ;;  %v609_v23 = vadd.f32 %v608_v50, %v527_v11  ;;  %v700_v24 = vadd.f32 %v8010_v56, %v617_v10  ;;  %v9881_v22 = vand.u32 4294901760, %v7012_v17  ;;  %v9906_v8 = vsub.f32 %v7014_v38, %v9891_v37 }
 0x12c   : > { %8470 = vmatprep.mubr.f32.mxu0 %v9726_v16  ;;  %8476 = vmatpush3.msra.mxu1 %v9722_v13  ;;  %v693_v32 = vpop.f32.mrf.mxu0 }
 0x12d   : > { %8477 = vmatprep.mubr.f32.mxu1 %v9726_v16  ;;  %8480 = vmatprep.subr.mxu0 %v9801_v42  ;;  %v779_v6 = vadd.f32 %v8017_v61, %v700_v24  ;;  %v694_v13 = vadd.f32 %v693_v32, %v609_v23  ;;  %v8031_v30 = vpop.f32.mrf.mxu1  ;;  %v7017_v16 = vsel %vm189_vm0, %v6496_v1, 0  ;;  %v7088_v60 = vand.u32 4294901760, %v9906_v8 }
 0x12e   : > { %8471 = vmatmul.mubr.f32.vlgmr.msra.gmra.mxu0 %v9732_v14  ;;  %8478 = vmatmul.mubr.f32.vlgmr.msra.gmra.mxu1 %v9732_v14  ;;  %v8024_v33 = vpop.f32.mrf.mxu0  ;;  %v9895_v14 = vsub.f32 %v7012_v17, %v9881_v22  ;;  %v9897_v7 = vand.u32 4294901760, %v7017_v16 }
 0x12f   : > { %8481 = vmatpush3.msra.mxu0 %v9801_v42  ;;  %8487 = vmatprep.subr.mxu1 %v6626_v21  ;;  %v773_v34 = vadd.f32 %v772_v12, %v694_v13  ;;  %v872_v35 = vadd.f32 %v8024_v33, %v779_v6  ;;  %v952_v40 = vpop.f32.mrf.mxu1 }
 0x130   : > { %8482 = vmatprep.subr.mxu0 %v9806_v44  ;;  %8488 = vmatpush3.msra.mxu1 %v6626_v21  ;;  %v861_v39 = vpop.f32.mrf.mxu0  ;;  %v9911_v51 = vand.u32 4294901760, %v9895_v14  ;;  %v9916_v55 = vsub.f32 %v7017_v16, %v9897_v7 }
 0x131   : > { %8483 = vmatpush3.msra.mxu0 %v9806_v44  ;;  %8489 = vmatprep.subr.mxu1 %v6633_v9  ;;  %v959_v41 = vadd.f32 %v8031_v30, %v872_v35  ;;  %v862_v43 = vadd.f32 %v861_v39, %v773_v34 }
 0x132   : > { %8484 = vmatprep.mubr.f32.mxu0 %v6577_v31  ;;  %8490 = vmatpush3.msra.mxu1 %v6633_v9  ;;  %v7098_v5 = vand.u32 4294901760, %v9916_v55 }
 0x133   : > { %8491 = vmatprep.mubr.f32.mxu1 %v9811_v19  ;;  %8494 = vmatprep.subr.mxu0 %v9815_v47  ;;  %v953_v46 = vadd.f32 %v952_v40, %v862_v43 }
 0x134   : > { %8485 = vmatmul.mubr.f32.vlgmr.msra.gmra.mxu0 %v6587_v36  ;;  %8492 = vmatmul.mubr.f32.vlgmr.msra.gmra.mxu1 %v9820_v49  ;;  %v8038_v48 = vpop.f32.mrf.mxu0  ;;  %v8045_v50 = vpop.f32.mrf.mxu1 }
 0x135   : > { %8495 = vmatpush3.msra.mxu0 %v9815_v47  ;;  %8501 = vmatprep.subr.mxu1 %v9801_v42  ;;  %v1042_v52 = vadd.f32 %v8038_v48, %v959_v41  ;;  %v9921_v47 = vand.u32 4294901760, %v9902_v45 }
 0x136   : > { %8496 = vmatprep.subr.mxu0 %v9818_v2  ;;  %8502 = vmatpush3.msra.mxu1 %v9801_v42  ;;  %v1034_v57 = vpop.f32.mrf.mxu0  ;;  %v1116_v58 = vpop.f32.mrf.mxu1 }
 0x137   : > { %8497 = vmatpush3.msra.mxu0 %v9818_v2  ;;  %8503 = vmatprep.subr.mxu1 %v9806_v44  ;;  %v1125_v59 = vadd.f32 %v8045_v50, %v1042_v52  ;;  %v1035_v61 = vadd.f32 %v1034_v57, %v953_v46  ;;  %v7138_v2 = vsub.f32 %v9895_v14, %v9911_v51 }
 0x138   : > { %8498 = vmatprep.mubr.f32.mxu0 %v9826_v20  ;;  %8504 = vmatpush3.msra.mxu1 %v9806_v44  ;;  %v7145_v20 = vsub.f32 %v9902_v45, %v9921_v47 }
 0x139   : > { %8505 = vmatprep.mubr.f32.mxu1 %v6575_v62  ;;  %8508 = vmatprep.subr.mxu0 %v9831_v28  ;;  %v1117_v63 = vadd.f32 %v1116_v58, %v1035_v61 }
 0x13a   : > { %8499 = vmatmul.mubr.f32.vlgmr.msra.gmra.mxu0 %v9839_v29  ;;  %8506 = vmatmul.mubr.f32.vlgmr.msra.gmra.mxu1 %v6585_v0  ;;  %v8052_v15 = vpop.f32.mrf.mxu0  ;;  %v8059_v3 = vpop.f32.mrf.mxu1  ;;  %v7089_v29 = vsub.f32 %v9906_v8, %v7088_v60  ;;  %v7146_v12 = vand.u32 4294901760, %v7145_v20 }
 0x13b   : > { %8509 = vmatpush3.msra.mxu0 %v9831_v28  ;;  %8515 = vmatprep.subr.mxu1 %v9801_v42  ;;  %v1208_v62 = vadd.f32 %v8052_v15, %v1125_v59  ;;  %v7139_v28 = vand.u32 4294901760, %v7138_v2 }
 0x13c   : > { %8510 = vmatprep.subr.mxu0 %v9836_v54  ;;  %8516 = vmatpush3.msra.mxu1 %v9801_v42  ;;  %v1201_v0 = vpop.f32.mrf.mxu0  ;;  %v1280_v4 = vpop.f32.mrf.mxu1  ;;  %v7099_v42 = vsub.f32 %v9916_v55, %v7098_v5  ;;  %v7090_v53 = vand.u32 4294901760, %v7089_v29 }
 0x13d   : > { %8511 = vmatpush3.msra.mxu0 %v9836_v54  ;;  %8517 = vmatprep.subr.mxu1 %v9806_v44  ;;  %v9946_v10 = vadd.f32 %v8059_v3, %v1208_v62  ;;  %v1202_v11 = vadd.f32 %v1201_v0, %v1117_v63 }
 0x13e   : > { %8512 = vmatprep.mubr.f32.mxu0 %v9811_v19  ;;  %8518 = vmatpush3.msra.mxu1 %v9806_v44 }
 0x13f   : > { %8519 = vmatprep.mubr.f32.mxu1 %v9811_v19  ;;  %8522 = vmatprep.subr.mxu0 %v9881_v22  ;;  %v9955_v54 = vadd.f32 %v1280_v4, %v1202_v11  ;;  %v7100_v19 = vand.u32 4294901760, %v7099_v42 }
 0x140   : > { %8513 = vmatmul.mubr.f32.vlgmr.msra.gmra.mxu0 %v9820_v49  ;;  %8520 = vmatmul.mubr.f32.vlgmr.msra.gmra.mxu1 %v9820_v49  ;;  %v8066_v17 = vpop.f32.mrf.mxu0  ;;  %v8073_v18 = vpop.f32.mrf.mxu1 }
 0x141   : > { %8523 = vmatpush3.msra.mxu0 %v9881_v22  ;;  %8529 = vmatprep.subr.mxu1 %v7139_v28  ;;  %v1470_v44 = vadd.f32 %v8073_v18, %v8066_v17 }
 0x142   : > { %8524 = vmatprep.subr.mxu0 %v9887_v26  ;;  %8530 = vmatpush3.msra.mxu1 %v7139_v28  ;;  %v1372_v56 = vpop.f32.mrf.mxu0  ;;  %v1463_v21 = vpop.f32.mrf.mxu1 }
 0x143   : > { %8525 = vmatpush3.msra.mxu0 %v9887_v26  ;;  %8531 = vmatprep.subr.mxu1 %v7146_v12  ;;  %v1464_v23 = vadd.f32 %v1463_v21, %v1372_v56 }
 0x144   : > { %8526 = vmatprep.mubr.f32.mxu0 %v7090_v53  ;;  %8532 = vmatpush3.msra.mxu1 %v7146_v12 }
 0x145   : > { %8533 = vmatprep.mubr.f32.mxu1 %v9891_v37  ;;  %8536 = vmatprep.subr.mxu0 %v9895_v14 }
 0x146   : > { %8527 = vmatmul.mubr.f32.vlgmr.msra.gmra.mxu0 %v7100_v19  ;;  %8534 = vmatmul.mubr.f32.vlgmr.msra.gmra.mxu1 %v9897_v7  ;;  %v8080_v49 = vpop.f32.mrf.mxu0  ;;  %v8087_v24 = vpop.f32.mrf.mxu1 }
 0x147   : > { %8537 = vmatpush3.msra.mxu0 %v9895_v14  ;;  %8543 = vmatprep.subr.mxu1 %v9881_v22  ;;  %v1553_v9 = vadd.f32 %v8080_v49, %v1470_v44 }
 0x148   : > { %8538 = vmatprep.subr.mxu0 %v9902_v45  ;;  %8544 = vmatpush3.msra.mxu1 %v9881_v22  ;;  %v1545_v25 = vpop.f32.mrf.mxu0  ;;  %v1627_v27 = vpop.f32.mrf.mxu1 }
 0x149   : > { %8539 = vmatpush3.msra.mxu0 %v9902_v45  ;;  %8545 = vmatprep.subr.mxu1 %v9887_v26  ;;  %v1636_v1 = vadd.f32 %v8087_v24, %v1553_v9  ;;  %v1546_v32 = vadd.f32 %v1545_v25, %v1464_v23 }
 0x14a   : > { %8540 = vmatprep.mubr.f32.mxu0 %v9906_v8  ;;  %8546 = vmatpush3.msra.mxu1 %v9887_v26 }
 0x14b   : > { %8547 = vmatprep.mubr.f32.mxu1 %v7088_v60  ;;  %8550 = vmatprep.subr.mxu0 %v9911_v51  ;;  %v1628_v38 = vadd.f32 %v1627_v27, %v1546_v32 }
 0x14c   : > { %8541 = vmatmul.mubr.f32.vlgmr.msra.gmra.mxu0 %v9916_v55  ;;  %8548 = vmatmul.mubr.f32.vlgmr.msra.gmra.mxu1 %v7098_v5  ;;  %v8094_v6 = vpop.f32.mrf.mxu0  ;;  %v8101_v13 = vpop.f32.mrf.mxu1 }
 0x14d   : > { %8551 = vmatpush3.msra.mxu0 %v9911_v51  ;;  %8557 = vmatprep.subr.mxu1 %v9881_v22  ;;  %v1719_v30 = vadd.f32 %v8094_v6, %v1636_v1 }
 0x14e   : > { %8552 = vmatprep.subr.mxu0 %v9921_v47  ;;  %8558 = vmatpush3.msra.mxu1 %v9881_v22  ;;  %v1712_v31 = vpop.f32.mrf.mxu0  ;;  %v1791_v33 = vpop.f32.mrf.mxu1 }
 0x14f   : > { %8553 = vmatpush3.msra.mxu0 %v9921_v47  ;;  %8559 = vmatprep.subr.mxu1 %v9887_v26  ;;  %v1798_v16 = vadd.f32 %v8101_v13, %v1719_v30  ;;  %v1713_v34 = vadd.f32 %v1712_v31, %v1628_v38 }
 0x150   : > { %8554 = vmatprep.mubr.f32.mxu0 %v9891_v37  ;;  %8560 = vmatpush3.msra.mxu1 %v9887_v26 }
 0x151   : > { %8561 = vmatprep.mubr.f32.mxu1 %v9891_v37  ;;  %8555 = vmatmul.mubr.f32.vlgmr.msra.gmra.mxu0 %v9897_v7  ;;  %v1792_v35 = vadd.f32 %v1791_v33, %v1713_v34 }
 0x152   : > { %8562 = vmatmul.mubr.f32.vlgmr.msra.gmra.mxu1 %v9897_v7  ;;  %v8108_v22 = vpop.f32.mrf.mxu0  ;;  %v8115_v36 = vpop.f32.mrf.mxu1 }
 0x153   : > { %v1891_v39 = vadd.f32 %v8108_v22, %v1798_v16 }
 0x154   : > { %v1880_v40 = vpop.f32.mrf.mxu0  ;;  %v1971_v14 = vpop.f32.mrf.mxu1 }
 0x155   : > { %v1978_v41 = vadd.f32 %v8115_v36, %v1891_v39  ;;  %v1881_v43 = vadd.f32 %v1880_v40, %v1792_v35 }
 0x157   : > { %v1972_v45 = vadd.f32 %v1971_v14, %v1881_v43 }
 0x158   : > { %v8122_v46 = vpop.f32.mrf.mxu0  ;;  %v8129_v8 = vpop.f32.mrf.mxu1 }
 0x159   : > { %v2061_v48 = vadd.f32 %v8122_v46, %v1978_v41 }
 0x15a   : > { %v2053_v50 = vpop.f32.mrf.mxu0  ;;  %v2135_v26 = vpop.f32.mrf.mxu1 }
 0x15b   : > { %v2144_v51 = vadd.f32 %v8129_v8, %v2061_v48  ;;  %v2054_v37 = vadd.f32 %v2053_v50, %v1972_v45 }
 0x15d   : > { %v2136_v52 = vadd.f32 %v2135_v26, %v2054_v37 }
 0x15e   : > { %v8136_v55 = vpop.f32.mrf.mxu0  ;;  %v8143_v57 = vpop.f32.mrf.mxu1 }
 0x15f   : > { %v2227_v58 = vadd.f32 %v8136_v55, %v2144_v51 }
 0x160   : > { %v2220_v7 = vpop.f32.mrf.mxu0  ;;  %v2299_v47 = vpop.f32.mrf.mxu1 }
 0x161   : > { %v2306_v59 = vadd.f32 %v8143_v57, %v2227_v58  ;;  %v2221_v61 = vadd.f32 %v2220_v7, %v2136_v52 }
 0x163   : > { %v2300_v60 = vadd.f32 %v2299_v47, %v2221_v61 }
 0x164   : > { %v8150_v2 = vpop.f32.mrf.mxu0  ;;  %v8157_v63 = vpop.f32.mrf.mxu1 }
 0x165   : > { %v2510_v5 = vadd.f32 %v8157_v63, %v8150_v2 }
 0x166   : > { %v2412_v15 = vpop.f32.mrf.mxu0  ;;  %v2503_v3 = vpop.f32.mrf.mxu1 }
 0x167   : > { %v2504_v20 = vadd.f32 %v2503_v3, %v2412_v15 }
 0x16a   : > { %v8164_v62 = vpop.f32.mrf.mxu0  ;;  %v8171_v29 = vpop.f32.mrf.mxu1 }
 0x16b   : > { %v2593_v0 = vadd.f32 %v8164_v62, %v2510_v5 }
 0x16c   : > { %v2585_v4 = vpop.f32.mrf.mxu0  ;;  %v2667_v28 = vpop.f32.mrf.mxu1 }
 0x16d   : > { %v2676_v11 = vadd.f32 %v8171_v29, %v2593_v0  ;;  %v2586_v42 = vadd.f32 %v2585_v4, %v2504_v20 }
 0x16f   : > { %v2668_v12 = vadd.f32 %v2667_v28, %v2586_v42 }
 0x170   : > { %v8178_v53 = vpop.f32.mrf.mxu0  ;;  %v8185_v17 = vpop.f32.mrf.mxu1 }
 0x171   : > { %v2759_v18 = vadd.f32 %v8178_v53, %v2676_v11 }
 0x172   : > { %v2752_v44 = vpop.f32.mrf.mxu0  ;;  %v2831_v19 = vpop.f32.mrf.mxu1 }
 0x173   : > { %v2838_v56 = vadd.f32 %v8185_v17, %v2759_v18  ;;  %v2753_v21 = vadd.f32 %v2752_v44, %v2668_v12 }
 0x175   : > { %v2842_v23 = vadd.f32 %v2838_v56, %v9946_v10  ;;  %v2832_v49 = vadd.f32 %v2831_v19, %v2753_v21 }
 0x176   : > { %v8192_v24 = vpop.f32.mrf.mxu0  ;;  %v8199_v9 = vpop.f32.mrf.mxu1 }
 0x177   : > { %v2841_v25 = vadd.f32 %v2832_v49, %v9955_v54  ;;  %v3023_v27 = vadd.f32 %v8199_v9, %v8192_v24 }
 0x178   : > { %v2925_v1 = vpop.f32.mrf.mxu0  ;;  %v3016_v32 = vpop.f32.mrf.mxu1 }
 0x179   : > { %v3017_v38 = vadd.f32 %v3016_v32, %v2925_v1 }
 0x17c   : > { %v8206_v6 = vpop.f32.mrf.mxu0  ;;  %v8213_v13 = vpop.f32.mrf.mxu1 }
 0x17d   : > { %v3106_v30 = vadd.f32 %v8206_v6, %v3023_v27 }
 0x17e   : > { %v3098_v31 = vpop.f32.mrf.mxu0  ;;  %v3180_v33 = vpop.f32.mrf.mxu1 }
 0x17f   : > { %v3189_v16 = vadd.f32 %v8213_v13, %v3106_v30  ;;  %v3099_v34 = vadd.f32 %v3098_v31, %v3017_v38 }
 0x181   : > { %v3181_v35 = vadd.f32 %v3180_v33, %v3099_v34 }
 0x182   : > { %v8220_v22 = vpop.f32.mrf.mxu0  ;;  %v8227_v36 = vpop.f32.mrf.mxu1 }
 0x183   : > { %v3272_v10 = vadd.f32 %v8220_v22, %v3189_v16 }
 0x184   : > { %v3265_v39 = vpop.f32.mrf.mxu0  ;;  %v3344_v40 = vpop.f32.mrf.mxu1 }
 0x185   : > { %v3351_v14 = vadd.f32 %v8227_v36, %v3272_v10  ;;  %v3266_v41 = vadd.f32 %v3265_v39, %v3181_v35 }
 0x187   : > { %v3355_v54 = vadd.f32 %v3351_v14, %v2306_v59  ;;  %v3345_v43 = vadd.f32 %v3344_v40, %v3266_v41 }
 0x188   : > { %v8234_v45 = vpop.f32.mrf.mxu0  ;;  %v8241_v46 = vpop.f32.mrf.mxu1 }
 0x189   : > { %v3354_v8 = vadd.f32 %v3345_v43, %v2300_v60  ;;  %v3536_v48 = vadd.f32 %v8241_v46, %v8234_v45 }
 0x18a   : > { %v3438_v50 = vpop.f32.mrf.mxu0  ;;  %v3529_v26 = vpop.f32.mrf.mxu1 }
 0x18b   : > { %v3530_v51 = vadd.f32 %v3529_v26, %v3438_v50 }
 0x18e   : > { %v8248_v37 = vpop.f32.mrf.mxu0  ;;  %v8255_v52 = vpop.f32.mrf.mxu1 }
 0x18f   : > { %v3619_v55 = vadd.f32 %v8248_v37, %v3536_v48 }
 0x190   : > { %v3611_v57 = vpop.f32.mrf.mxu0  ;;  %v3693_v58 = vpop.f32.mrf.mxu1 }
 0x191   : > { %v3702_v7 = vadd.f32 %v8255_v52, %v3619_v55  ;;  %v3612_v47 = vadd.f32 %v3611_v57, %v3530_v51 }
 0x193   : > { %v3694_v61 = vadd.f32 %v3693_v58, %v3612_v47 }
 0x194   : > { %v8262_v2 = vpop.f32.mrf.mxu0  ;;  %v8269_v63 = vpop.f32.mrf.mxu1 }
 0x195   : > { %v3785_v5 = vadd.f32 %v8262_v2, %v3702_v7 }
 0x196   : > { %v3778_v59 = vpop.f32.mrf.mxu0  ;;  %v3857_v15 = vpop.f32.mrf.mxu1 }
 0x197   : > { %v3864_v3 = vadd.f32 %v8269_v63, %v3785_v5  ;;  %v3779_v20 = vadd.f32 %v3778_v59, %v3694_v61 }
 0x199   : > { %v9992_v60 = vadd.f32 %v3864_v3, %v2842_v23  ;;  %v3858_v62 = vadd.f32 %v3857_v15, %v3779_v20 }
 0x19a   : > { %v8276_v29 = vpop.f32.mrf.mxu0  ;;  %v8283_v0 = vpop.f32.mrf.mxu1 }
 0x19b   : > { %10102 = vst [vmem:[#allocation10_spill] sm:$0xff] %v9992_v60  ;;  %v9994_v4 = vadd.f32 %v3858_v62, %v2841_v25  ;;  %v4049_v28 = vadd.f32 %v8283_v0, %v8276_v29 }
 0x19c   : > { %v3951_v11 = vpop.f32.mrf.mxu0  ;;  %v4042_v42 = vpop.f32.mrf.mxu1 }
 0x19d   : > { %10103 = vst [vmem:[#allocation11_spill] sm:$0xff] %v9994_v4  ;;  %v4043_v12 = vadd.f32 %v4042_v42, %v3951_v11 }
 0x1a0   : > { %v8290_v53 = vpop.f32.mrf.mxu0  ;;  %v8297_v17 = vpop.f32.mrf.mxu1 }
 0x1a1   : > { %v4132_v18 = vadd.f32 %v8290_v53, %v4049_v28 }
 0x1a2   : > { %v4124_v44 = vpop.f32.mrf.mxu0  ;;  %v4206_v19 = vpop.f32.mrf.mxu1 }
 0x1a3   : > { %v4215_v56 = vadd.f32 %v8297_v17, %v4132_v18  ;;  %v4125_v21 = vadd.f32 %v4124_v44, %v4043_v12 }
 0x1a5   : > { %v4207_v49 = vadd.f32 %v4206_v19, %v4125_v21 }
 0x1a6   : > { %v8304_v24 = vpop.f32.mrf.mxu0  ;;  %v8311_v23 = vpop.f32.mrf.mxu1 }
 0x1a7   : > { %v4298_v9 = vadd.f32 %v8304_v24, %v4215_v56 }
 0x1a8   : > { %v4291_v27 = vpop.f32.mrf.mxu0  ;;  %v4370_v1 = vpop.f32.mrf.mxu1 }
 0x1a9   : > { %v4377_v32 = vadd.f32 %v8311_v23, %v4298_v9  ;;  %v4292_v25 = vadd.f32 %v4291_v27, %v4207_v49 }
 0x1ab   : > { %v9996_v38 = vadd.f32 %v4377_v32, %v3355_v54  ;;  %v4371_v6 = vadd.f32 %v4370_v1, %v4292_v25 }
 0x1ac   : > { %v8318_v13 = vpop.f32.mrf.mxu0  ;;  %v8325_v30 = vpop.f32.mrf.mxu1 }
 0x1ad   : > { %10104 = vst [vmem:[#allocation12_spill] sm:$0xff] %v9996_v38  ;;  %v9998_v31 = vadd.f32 %v4371_v6, %v3354_v8  ;;  %v4583_v1 = vadd.f32 %v8325_v30, %v8318_v13 }
 0x1ae   : > { %v4485_v33 = vpop.f32.mrf.mxu0  ;;  %v4576_v16 = vpop.f32.mrf.mxu1 }
 0x1af   : > { %10105 = vst [vmem:[#allocation13_spill] sm:$0xff] %v9998_v31  ;;  %v4577_v32 = vadd.f32 %v4576_v16, %v4485_v33 }
 0x1b2   : > { %v8332_v34 = vpop.f32.mrf.mxu0  ;;  %v10000_v35 = vpop.f32.mrf.mxu1 }
 0x1b3   : > { %v4666_v4 = vadd.f32 %v8332_v34, %v4583_v1 }
 0x1b4   : > { %v4658_v22 = vpop.f32.mrf.mxu0  ;;  %v10002_v36 = vpop.f32.mrf.mxu1 }
 0x1b5   : > { %v4659_v38 = vadd.f32 %v4658_v22, %v4577_v32  ;;  %v4749_v30 = vadd.f32 %v10000_v35, %v4666_v4 }
 0x1b7   : > { %v4741_v33 = vadd.f32 %v10002_v36, %v4659_v38 }
 0x1b8   : > { %v10004_v10 = vpop.f32.mrf.mxu0  ;;  %v10006_v39 = vpop.f32.mrf.mxu1 }
 0x1b9   : > { %10106 = vst [vmem:[#allocation14_spill] sm:$0xff] %v10006_v39 }
 0x1ba   : > { %v10008_v40 = vpop.f32.mrf.mxu0  ;;  %v10010_v14 = vpop.f32.mrf.mxu1 }
 0x1bb   : > { %10107 = vst [vmem:[#allocation15_spill] sm:$0xff] %v10010_v14  ;;  %v4826_v4 = vadd.f32 %v10008_v40, %v4741_v33 }
 0x1be   : > { %v8360_v41 = vpop.f32.mrf.mxu0  ;;  %v8367_v54 = vpop.f32.mrf.mxu1 }
 0x1bf   : > { %v5096_v25 = vadd.f32 %v8367_v54, %v8360_v41 }
 0x1c0   : > { %v4998_v43 = vpop.f32.mrf.mxu0  ;;  %v5089_v45 = vpop.f32.mrf.mxu1 }
 0x1c2   : > { %v10118_v40 = vld [vmem:[#allocation15_spill] sm:$0xff] }
 0x1c4   : > { %v8374_v46 = vpop.f32.mrf.mxu0  ;;  %v8381_v8 = vpop.f32.mrf.mxu1 }
 0x1c6   : > { %v5171_v48 = vpop.f32.mrf.mxu0  ;;  %v10012_v50 = vpop.f32.mrf.mxu1 }
 0x1ca   : > { %v10014_v26 = vpop.f32.mrf.mxu0  ;;  %v10016_v51 = vpop.f32.mrf.mxu1 }
 0x1cb   : > { %10108 = vst [vmem:[#allocation16_spill] sm:$0xff] %v10016_v51 }
 0x1cc   : > { %v10018_v37 = vpop.f32.mrf.mxu0  ;;  %v10020_v52 = vpop.f32.mrf.mxu1 }
 0x1cd   : > { %10109 = vst [vmem:[#allocation17_spill] sm:$0xff] %v10020_v52 }
 0x1d0   : > { %v8402_v55 = vpop.f32.mrf.mxu0  ;;  %v8409_v57 = vpop.f32.mrf.mxu1 }
 0x1d1   : > { %v5630_v60 = vadd.f32 %v8409_v57, %v8402_v55 }
 0x1d2   : > { %v5532_v58 = vpop.f32.mrf.mxu0  ;;  %v5623_v7 = vpop.f32.mrf.mxu1 }
 0x1d3   : > { %v5624_v51 = vadd.f32 %v5623_v7, %v5532_v58  ;;  %v4832_v7 = vadd.f32 %v10004_v10, %v4749_v30 }
 0x1d6   : > { %v8416_v47 = vpop.f32.mrf.mxu0  ;;  %v8423_v61 = vpop.f32.mrf.mxu1 }
 0x1d7   : > { %v5713_v14 = vadd.f32 %v8416_v47, %v5630_v60 }
 0x1d8   : > { %v5705_v2 = vpop.f32.mrf.mxu0  ;;  %v5787_v63 = vpop.f32.mrf.mxu1 }
 0x1d9   : > { %v5706_v16 = vadd.f32 %v5705_v2, %v5624_v51  ;;  %v5796_v55 = vadd.f32 %v8423_v61, %v5713_v14 }
 0x1db   : > { %v5788_v47 = vadd.f32 %v5787_v63, %v5706_v16 }
 0x1dc   : > { %v10022_v5 = vpop.f32.mrf.mxu0  ;;  %v10024_v59 = vpop.f32.mrf.mxu1 }
 0x1dd   : > { %10110 = vst [vmem:[#allocation18_spill] sm:$0xff] %v10024_v59  ;;  %v5879_v51 = vadd.f32 %v10022_v5, %v5796_v55 }
 0x1de   : > { %v10026_v15 = vpop.f32.mrf.mxu0  ;;  %v10028_v3 = vpop.f32.mrf.mxu1 }
 0x1df   : > { %10111 = vst [vmem:[#allocation19_spill] sm:$0xff] %v10026_v15  ;;  %10112 = vst [vmem:[#allocation20_spill] sm:$0xff] %v10028_v3  ;;  %v5090_v3 = vadd.f32 %v5089_v45, %v4998_v43 }
 0x1e2   : > { %v8444_v20 = vpop.f32.mrf.mxu0  ;;  %v8451_v62 = vpop.f32.mrf.mxu1 }
 0x1e4   : > { %v6045_v29 = vpop.f32.mrf.mxu0  ;;  %v6136_v0 = vpop.f32.mrf.mxu1 }
 0x1e5   : > { %v6137_v15 = vadd.f32 %v6136_v0, %v6045_v29  ;;  %v4905_v29 = vadd.f32 %v10118_v40, %v4826_v4 }
 0x1e8   : > { %v8458_v28 = vpop.f32.mrf.mxu0  ;;  %v8465_v11 = vpop.f32.mrf.mxu1 }
 0x1ea   : > { %v6218_v42 = vpop.f32.mrf.mxu0  ;;  %v6300_v12 = vpop.f32.mrf.mxu1 }
 0x1eb   : > { %v6219_v22 = vadd.f32 %v6218_v42, %v6137_v15  ;;  %v10116_v15 = vld [vmem:[#allocation14_spill] sm:$0xff] }
 0x1ed   : > { %v6301_v35 = vadd.f32 %v6300_v12, %v6219_v22  ;;  %v10121_v12 = vld [vmem:[#allocation17_spill] sm:$0xff]  ;;  %v10128_v22 = vld [vmem:[#allocation11_spill] sm:$0xff] }
 0x1ee   : > { %v8472_v53 = vpop.f32.mrf.mxu0  ;;  %v10030_v17 = vpop.f32.mrf.mxu1 }
 0x1ef   : > { %10113 = vst [vmem:[#allocation21_spill] sm:$0xff] %v10030_v17  ;;  %v5179_v17 = vadd.f32 %v8374_v46, %v5096_v25  ;;  %v10126_v25 = vld [vmem:[#allocation12_spill] sm:$0xff] }
 0x1f0   : > { %v10032_v18 = vpop.f32.mrf.mxu0  ;;  %v10034_v44 = vpop.f32.mrf.mxu1 }
 0x1f1   : > { %10114 = vst [vmem:[#allocation22_spill] sm:$0xff] %v10032_v18  ;;  %10115 = vst [vmem:[#allocation23_spill] sm:$0xff] %v10034_v44  ;;  %v6143_v44 = vadd.f32 %v8451_v62, %v8444_v20  ;;  %v5172_v18 = vadd.f32 %v5171_v48, %v5090_v3  ;;  %v5262_v34 = vadd.f32 %v8381_v8, %v5179_v17  ;;  %v10117_v20 = vld [vmem:[#allocation19_spill] sm:$0xff]  ;;  %v10122_v17 = vld [vmem:[#allocation18_spill] sm:$0xff] }
 0x1f2   : > { %v4911_v3 = vadd.f32 %v10116_v15, %v4832_v7  ;;  %v5873_v10 = vadd.f32 %v10117_v20, %v5788_v47 }
 0x1f3   : > { %v6226_v39 = vadd.f32 %v8458_v28, %v6143_v44  ;;  %v5254_v46 = vadd.f32 %v10012_v50, %v5172_v18  ;;  %v5345_v38 = vadd.f32 %v10014_v26, %v5262_v34  ;;  %v10119_v26 = vld [vmem:[#allocation16_spill] sm:$0xff]  ;;  %v5958_v18 = vadd.f32 %v10122_v17, %v5879_v51 }
 0x1f4   : > { %v8486_v19 = vpop.f32.mrf.mxu0  ;;  %v8493_v56 = vpop.f32.mrf.mxu1 }
 0x1f5   : > { %v6677_v13 = vadd.f32 %v8493_v56, %v8486_v19  ;;  %v6309_v48 = vadd.f32 %v8465_v11, %v6226_v39  ;;  %v5339_v8 = vadd.f32 %v10018_v37, %v5254_v46  ;;  %v5424_v0 = vadd.f32 %v10119_v26, %v5345_v38 }
 0x1f6   : > { %v6579_v21 = vpop.f32.mrf.mxu0  ;;  %v6670_v49 = vpop.f32.mrf.mxu1  ;;  %v10123_v56 = vld [vmem:[#allocation21_spill] sm:$0xff]  ;;  %v7526_v38 = vstv %s10055_s18 }
 0x1f7   : > { %v6671_v41 = vadd.f32 %v6670_v49, %v6579_v21  ;;  %v6392_v50 = vadd.f32 %v8472_v53, %v6309_v48  ;;  %v5418_v53 = vadd.f32 %v10121_v12, %v5339_v8 }
 0x1f8   : > { %v10120_v28 = vld [vmem:[#allocation22_spill] sm:$0xff] }
 0x1f9   : > { %v6386_v11 = vadd.f32 %v10120_v28, %v6301_v35  ;;  %v6471_v21 = vadd.f32 %v10123_v56, %v6392_v50 }
 0x1fa   : > { %v8500_v24 = vpop.f32.mrf.mxu0  ;;  %v8507_v23 = vpop.f32.mrf.mxu1 }
 0x1fb   : > { %v6760_v54 = vadd.f32 %v8500_v24, %v6677_v13  ;;  %v10124_v24 = vld [vmem:[#allocation10_spill] sm:$0xff]  ;;  %v10127_v13 = vld [vmem:[#allocation23_spill] sm:$0xff] }
 0x1fc   : > { %v6752_v9 = vpop.f32.mrf.mxu0  ;;  %v6834_v27 = vpop.f32.mrf.mxu1  ;;  %v6465_v30 = vadd.f32 %v10127_v13, %v6386_v11 }
 0x1fd   : > { %v6753_v57 = vadd.f32 %v6752_v9, %v6671_v41  ;;  %v6843_v36 = vadd.f32 %v8507_v23, %v6760_v54  ;;  %v4915_v23 = vadd.f32 %v4911_v3, %v10124_v24  ;;  %v10125_v9 = vld [vmem:[#allocation20_spill] sm:$0xff]  ;;  %v4914_v41 = vadd.f32 %v4905_v29, %v10128_v22  ;;  %v10129_v54 = vld [vmem:[#allocation13_spill] sm:$0xff] }
 0x1ff   : > { %v6835_v14 = vadd.f32 %v6834_v27, %v6753_v57  ;;  %v5952_v27 = vadd.f32 %v10125_v9, %v5873_v10 }
 0x200   : > { %v8514_v6 = vpop.f32.mrf.mxu0  ;;  %v10036_v31 = vpop.f32.mrf.mxu1 }
 0x201   : > { %v6926_v37 = vadd.f32 %v8514_v6, %v6843_v36  ;;  %v5428_v6 = vadd.f32 %v5424_v0, %v10126_v25 }
 0x202   : > { %v6919_v59 = vpop.f32.mrf.mxu0  ;;  %v10038_v52 = vpop.f32.mrf.mxu1 }
 0x203   : > { %v6920_v49 = vadd.f32 %v6919_v59, %v6835_v14  ;;  %v7005_v33 = vadd.f32 %v10036_v31, %v6926_v37  ;;  %v5962_v59 = vadd.f32 %v5958_v18, %v4915_v23  ;;  %v6475_v46 = vadd.f32 %v6471_v21, %v5428_v6 }
 0x205   : > { %v6999_v55 = vadd.f32 %v10038_v52, %v6920_v49  ;;  %v7009_v47 = vadd.f32 %v7005_v33, %v5962_v59 }
 0x206   : > { %v8528_v43 = vpop.f32.mrf.mxu0  ;;  %v8535_v45 = vpop.f32.mrf.mxu1 }
 0x207   : > { %v7190_v2 = vadd.f32 %v8535_v45, %v8528_v43  ;;  %v5427_v43 = vadd.f32 %v5418_v53, %v10129_v54 }
 0x208   : > { %v7092_v60 = vpop.f32.mrf.mxu0  ;;  %v7183_v58 = vpop.f32.mrf.mxu1 }
 0x209   : > { %v7184_v63 = vadd.f32 %v7183_v58, %v7092_v60  ;;  %v5961_v60 = vadd.f32 %v5952_v27, %v4914_v41  ;;  %v6474_v7 = vadd.f32 %v6465_v30, %v5427_v43 }
 0x20b   : > { %v7008_v35 = vadd.f32 %v6999_v55, %v5961_v60 }
 0x20c   : > { %v8542_v39 = vpop.f32.mrf.mxu0  ;;  %v8549_v61 = vpop.f32.mrf.mxu1 }
 0x20d   : > { %v7273_v62 = vadd.f32 %v8542_v39, %v7190_v2 }
 0x20e   : > { %v7265_v42 = vpop.f32.mrf.mxu0  ;;  %v7347_v5 = vpop.f32.mrf.mxu1 }
 0x20f   : > { %v7356_v44 = vadd.f32 %v8549_v61, %v7273_v62  ;;  %v7266_v19 = vadd.f32 %v7265_v42, %v7184_v63 }
 0x211   : > { %v7348_v1 = vadd.f32 %v7347_v5, %v7266_v19  ;;  %v8556_v32 = vpop.f32.mrf.mxu0 }
 0x212   : > { %v7439_v16 = vadd.f32 %v8556_v32, %v7356_v44  ;;  %v8563_v34 = vpop.f32.mrf.mxu1 }
 0x213   : > { %v7432_v45 = vpop.f32.mrf.mxu0 }
 0x214   : > { %v7518_v48 = vadd.f32 %v8563_v34, %v7439_v16  ;;  %v7433_v57 = vadd.f32 %v7432_v45, %v7348_v1  ;;  %v7511_v58 = vpop.f32.mrf.mxu1 }
 0x216   : > { %v7522_v4 = vadd.f32 %v7518_v48, %v6475_v46  ;;  %v7512_v31 = vadd.f32 %v7511_v58, %v7433_v57 }
 0x218   : > { %v7524_v36 = vadd.f32 %v7522_v4, %v7009_v47  ;;  %v7521_v8 = vadd.f32 %v7512_v31, %v6474_v7 }
 0x21a   : > { %v7528_v51 = vadd.f32 %v7526_v38, %v7524_v36  ;;  %v7523_v2 = vadd.f32 %v7521_v8, %v7008_v35 }
 0x21c   : > { %v7635_v50 = vmul.f32 -1.442695, %v7528_v51  ;;  %v7527_v14 = vadd.f32 %v7526_v38, %v7523_v2 }
 0x21e   : > { %8616 = vpow2.f32 %v7635_v50  ;;  %v7634_v52 = vmul.f32 -1.442695, %v7527_v14 }
 0x220   : > { %8618 = vpow2.f32 %v7634_v52 }
 0x22b   : > { %v8617_v39 = vpop.eup %8616 }
 0x22c   : > { %v7536_v61 = vadd.f32 1.0, %v8617_v39 }
 0x22d   : > { %v8619_v15 = vpop.eup %8618 }
 0x22e   : > { %8620 = vrcp.f32 %v7536_v61  ;;  %v7535_v3 = vadd.f32 1.0, %v8619_v15 }
 0x230   : > { %8622 = vrcp.f32 %v7535_v3 }
 0x23b   : > { %v8621_v20 = vpop.eup %8620 }
 0x23c   : > { %7542 = vst.msk [vmem:[%s180_s10 + $0x8] sm:$0xff] %vm189_vm0, %v8621_v20 }
 0x23d   : > { %v8623_v10 = vpop.eup %8622 }
 0x23e   : > { %7541 = vst.msk [vmem:[%s180_s10] sm:$0xff] %vm189_vm0, %v8623_v10 }
 0x23f PF: > { %p15_p5 = scmp.ge.s32.totalorder %s8789_s23, 4   ;;  %s10130_s14 = smov %s8708_s15 }
 0x240   : > { %s10131_s15 = smov %s8712_s16  ;;  %s10132_s16 = smov %s8809_s4 }
 0x241   : > { %s10133_s17 = smov %s8789_s23  ;;  %17 = sbr.rel (!%p15_p5) target bundleno = 6 (0x6), region = 86 }
 0x246   :  { %7564 = vsyncpa [#allocation5], 1 }
 0x247   :  { %7566 = vsyncpa [#allocation5 + $0x1], 1 }
 0x248   :  { %7567 = vsyncpa [#allocation7], 1 }
 0x249   :  { %7569 = vsyncpa [#allocation7 + $0x1], 1 }

</bundles_post_ra>
